<compile_context>
chip_gen: v7x
topology: tpu7x:2x2x1
jax: 0.10.0
libtpu: 0.0.40
codegen_flags: <defaults>
</compile_context>

<pallas_src>
import functools

import jax
import jax.numpy as jnp
from jax.experimental import pallas as pl
from jax.experimental.pallas import tpu as pltpu


# ------------------------------ fused kernel --------------------------------


def _fused_body(x_ref, w_exp_ref, b1_ref, w_dw_ref, b2_ref, w_prj_ref, b3_ref,
                o_ref, hid_ref, *, expand, use_res, stride, tile_h, H, W,
                out_w, mm_dtype):
    C = hid_ref.shape[-1]          # hidden channels
    KH = hid_ref.shape[0]          # (tile_h - 1) * stride + 3 rows incl. halo
    Wp = hid_ref.shape[1]          # W + 2 (includes W halo)
    Cin = x_ref.shape[-1]
    Cout = o_ref.shape[-1]

    r0 = pl.program_id(1) * tile_h                       # first output row
    row0 = pl.multiple_of(r0 * stride, tile_h * stride)  # first padded-x row

    # ---- stage 1: 1x1 expand conv (BN folded) + ReLU6, result stays in VMEM -
    x_slab = x_ref[0, pl.ds(row0, KH), :, :]             # (KH, Wp, Cin)
    if expand:
        xm = x_slab.reshape(KH * Wp, Cin).astype(mm_dtype)
        h = jnp.dot(xm, w_exp_ref[...], preferred_element_type=jnp.float32)
        h = jnp.clip(h + b1_ref[...], 0.0, 6.0).reshape(KH, Wp, C)
        # Conv padding applies to the *hidden* activation, so halo rows/cols
        # must be exactly zero (bias + ReLU6 of the zero-padded input is not).
        rr = jax.lax.broadcasted_iota(jnp.int32, (KH, Wp, 1), 0)
        cc = jax.lax.broadcasted_iota(jnp.int32, (KH, Wp, 1), 1)
        orow = row0 - 1 + rr                              # original row index
        valid = (orow >= 0) & (orow < H) & (cc >= 1) & (cc <= W)
        hid_ref[...] = jnp.where(valid, h, 0.0)           # one full aligned store
    else:
        hid_ref[...] = x_slab.astype(jnp.float32)         # halos already zero

    # ---- stage 2: 3x3 depthwise conv (BN folded) + ReLU6 (VPU) --------------
    taps = [w_dw_ref[k:k + 1, :].reshape(1, 1, C) for k in range(9)]  # hoisted
    acc = jnp.zeros((tile_h, out_w, C), jnp.float32)
    for dy in range(3):
        for dx in range(3):
            if stride == 1:
                patch = hid_ref[dy:dy + tile_h, dx:dx + out_w, :]
            else:
                patch = hid_ref[pl.ds(dy, tile_h, stride=stride),
                                pl.ds(dx, out_w, stride=stride), :]
            acc = acc + patch * taps[dy * 3 + dx]
    d = jnp.clip(acc + b2_ref[...].reshape(1, 1, C), 0.0, 6.0)

    # ---- stage 3: 1x1 project conv (BN folded) (+ fused residual) -----------
    dm = d.reshape(tile_h * out_w, C).astype(mm_dtype)
    y = jnp.dot(dm, w_prj_ref[...], preferred_element_type=jnp.float32)
    y = y + b3_ref[...]
    if use_res:
        # stride == 1 and Cin == Cout here; "+1" skips the H/W padding halo.
        res = x_ref[0, pl.ds(row0 + 1, tile_h), pl.ds(1, W), :]
        y = y + res.reshape(tile_h * out_w, Cout)
    o_ref[0] = y.reshape(tile_h, out_w, Cout).astype(o_ref.dtype)


def _make_kernel(*, expand, use_res, stride, tile_h, H, W, out_w, mm_dtype):
    body = functools.partial(_fused_body, expand=expand, use_res=use_res,
                             stride=stride, tile_h=tile_h, H=H, W=W,
                             out_w=out_w, mm_dtype=mm_dtype)
    if expand:
        def kernel(x_ref, w_exp, b1, w_dw, b2, w_prj, b3, o_ref, hid_ref):
            body(x_ref, w_exp, b1, w_dw, b2, w_prj, b3, o_ref, hid_ref)
    else:
        def kernel(x_ref, w_dw, b2, w_prj, b3, o_ref, hid_ref):
            body(x_ref, None, None, w_dw, b2, w_prj, b3, o_ref, hid_ref)
    return kernel


# ------------------------------ wrapper --------------------------------------


def _pick_tile_h(Ho, Wp, Chid, stride, scratch_budget=2 << 20):
    """Largest divisor of Ho that (a) leaves >=2 row tiles per image when
    possible (pipelining / megacore) and (b) keeps the hidden-row scratch
    within a VMEM budget (re-derived per shape, v7x-safe)."""
    cap = max(1, Ho // 2)
    best = 1
    for th in range(1, cap + 1):
        if Ho % th:
            continue
        kh = (th - 1) * stride + 3
        if kh * Wp * Chid * 4 <= scratch_budget:
            best = th
    return best


def _vmem_limit_bytes(Hp, Wp, Cin, Chid, Cout, tile_h, out_w, KH, expand):
    f = 4
    x_blk = Hp * Wp * Cin * f
    w_bytes = ((Cin * Chid if expand else 0) + 9 * Chid + Chid * Cout
               + 2 * Chid + 2 * Cout) * f
    out_blk = tile_h * out_w * Cout * f
    scratch = KH * Wp * Chid * f
    tmp = (KH * Wp * Chid + 12 * tile_h * out_w * Chid) * f  # in-kernel values
    est = 2 * (x_blk + w_bytes + out_blk) + scratch + tmp    # 2x = double buffer
    return int(min(max(4 * est, 16 * 1024 * 1024), 64 * 1024 * 1024))


def inverted_residual_pallas(x_nchw, params, stride, expand_ratio, *,
                             mm_dtype=jnp.float32, tile_h=None):
    """Forward pass of InvertedResidual. Input/output are NCHW (PyTorch-style)."""
    assert stride in (1, 2)
    N, Cin, H, W = x_nchw.shape
    Chid = round(Cin * expand_ratio)
    Cout = params["w_proj"].shape[1]
    expand = expand_ratio != 1
    use_res = (stride == 1) and (Cin == Cout)

    Ho = (H - 1) // stride + 1
    Wo = (W - 1) // stride + 1
    Hp, Wp = H + 2, W + 2

    # NCHW -> NHWC (channels on the lane axis); pad the *small* input once in
    # H and W.  The large hidden tensor is never padded nor written to HBM.
    # TODO(synk): the transposes could be removed by keeping the surrounding
    #             model in NHWC; kept so the interface matches PyTorch.
    x = jnp.transpose(x_nchw, (0, 2, 3, 1)).astype(jnp.float32)
    xp = jnp.pad(x, ((0, 0), (1, 1), (1, 1), (0, 0)))

    th = _pick_tile_h(Ho, Wp, Chid, stride) if tile_h is None else tile_h
    assert Ho % th == 0
    num_row_tiles = Ho // th
    KH = (th - 1) * stride + 3

    kernel = _make_kernel(expand=expand, use_res=use_res, stride=stride,
                          tile_h=th, H=H, W=W, out_w=Wo, mm_dtype=mm_dtype)

    # Fold BN scales into the (tiny) conv weights once, wrapper side.
    def brow(v, c):
        return v.reshape(1, c).astype(jnp.float32)

    w_dw = (params["w_dw"].reshape(9, Chid)
            * params["s2"].reshape(1, Chid)).astype(jnp.float32)
    w_prj = (params["w_proj"] * params["s3"].reshape(1, Cout)).astype(mm_dtype)

    in_specs = [pl.BlockSpec((1, Hp, Wp, Cin), lambda n, r: (n, 0, 0, 0))]
    args = [xp]
    if expand:
        w_exp = (params["w_expand"]
                 * params["s1"].reshape(1, Chid)).astype(mm_dtype)
        in_specs += [pl.BlockSpec((Cin, Chid), lambda n, r: (0, 0)),
                     pl.BlockSpec((1, Chid), lambda n, r: (0, 0))]
        args += [w_exp, brow(params["b1"], Chid)]
    in_specs += [pl.BlockSpec((9, Chid), lambda n, r: (0, 0)),
                 pl.BlockSpec((1, Chid), lambda n, r: (0, 0)),
                 pl.BlockSpec((Chid, Cout), lambda n, r: (0, 0)),
                 pl.BlockSpec((1, Cout), lambda n, r: (0, 0))]
    args += [w_dw, brow(params["b2"], Chid), w_prj, brow(params["b3"], Cout)]

    y = pl.pallas_call(
        kernel,
        out_shape=jax.ShapeDtypeStruct((N, Ho, Wo, Cout), jnp.float32),
        grid=(N, num_row_tiles),
        in_specs=in_specs,
        out_specs=pl.BlockSpec((1, th, Wo, Cout), lambda n, r: (n, r, 0, 0)),
        scratch_shapes=[pltpu.VMEM((KH, Wp, Chid), jnp.float32)],
        compiler_params=pltpu.CompilerParams(
            dimension_semantics=("parallel", "parallel"),
            vmem_limit_bytes=_vmem_limit_bytes(Hp, Wp, Cin, Chid, Cout,
                                               th, Wo, KH, expand)),
    )(*args)

    return jnp.transpose(y, (0, 3, 1, 2))   # NHWC -> NCHW


# --------------------------- pure-JAX reference -------------------------------


def inverted_residual_ref(x_nchw, params, stride, expand_ratio):
    Cout = params["w_proj"].shape[1]
    Cin = x_nchw.shape[1]
    use_res = (stride == 1) and (Cin == Cout)
    x = jnp.transpose(x_nchw, (0, 2, 3, 1))
    h = x
    if expand_ratio != 1:
        h = jnp.einsum("nhwc,cd->nhwd", x, params["w_expand"])
        h = jnp.clip(h * params["s1"] + params["b1"], 0.0, 6.0)
    C = h.shape[-1]
    rhs = params["w_dw"].reshape(3, 3, 1, C)
    h = jax.lax.conv_general_dilated(
        h, rhs, window_strides=(stride, stride), padding=((1, 1), (1, 1)),
        dimension_numbers=("NHWC", "HWIO", "NHWC"), feature_group_count=C)
    h = jnp.clip(h * params["s2"] + params["b2"], 0.0, 6.0)
    y = jnp.einsum("nhwc,cd->nhwd", h, params["w_proj"])
    y = y * params["s3"] + params["b3"]
    if use_res:
        y = y + x
    return jnp.transpose(y, (0, 3, 1, 2))


# ---------------------------------- main --------------------------------------


def _make_bn(keys, c, eps=1e-5):
    gamma = 1.0 + 0.1 * jax.random.normal(keys[0], (c,), jnp.float32)
    beta = 0.1 * jax.random.normal(keys[1], (c,), jnp.float32)
    mean = 0.1 * jax.random.normal(keys[2], (c,), jnp.float32)
    var = 1.0 + 0.1 * jnp.abs(jax.random.normal(keys[3], (c,), jnp.float32))
    scale = gamma / jnp.sqrt(var + eps)
    bias = beta - mean * scale
    return scale, bias


def _make_inputs(key, N, Cin, Cout, H, W, expand_ratio):
    Chid = round(Cin * expand_ratio)
    keys = jax.random.split(key, 16)
    params = {
        "w_dw": 0.1 * jax.random.normal(keys[1], (3, 3, Chid), jnp.float32),
        "w_proj": 0.1 * jax.random.normal(keys[2], (Chid, Cout), jnp.float32),
    }
    if expand_ratio != 1:
        params["w_expand"] = 0.1 * jax.random.normal(keys[0], (Cin, Chid),
                                                     jnp.float32)
        params["s1"], params["b1"] = _make_bn(keys[3:7], Chid)
    params["s2"], params["b2"] = _make_bn(keys[7:11], Chid)
    params["s3"], params["b3"] = _make_bn(keys[11:15], Cout)
    x = jax.random.normal(keys[15], (N, Cin, H, W), jnp.float32)
    return params, x


if __name__ == "__main__":
    key = jax.random.PRNGKey(0)
    N = 2
    # (Cin, Cout, H, W, stride, expand_ratio, matmul dtype, tolerance)
    configs = [
        (8, 8, 16, 16, 1, 4, jnp.float32, 1e-4),    # residual path
        (8, 16, 16, 16, 2, 4, jnp.float32, 1e-4),   # stride 2, no residual
        (8, 8, 16, 16, 1, 1, jnp.float32, 1e-4),    # expand_ratio == 1 path
        (8, 8, 16, 16, 1, 4, jnp.bfloat16, 5e-2),   # bf16 MXU operands (v6e/v7x)
    ]
    for idx, (Cin, Cout, H, W, stride, er, mmdt, tol) in enumerate(configs):
        k = jax.random.fold_in(key, idx)
        params, x = _make_inputs(k, N, Cin, Cout, H, W, er)
        out = inverted_residual_pallas(x, params, stride, er, mm_dtype=mmdt)
        out = jax.block_until_ready(out)
        ref = inverted_residual_ref(x, params, stride, er)
        Ho = (H - 1) // stride + 1
        Wo = (W - 1) // stride + 1
        assert out.shape == (N, Cout, Ho, Wo), (idx, out.shape)
        if not jnp.allclose(out, ref, atol=tol, rtol=tol):
            err = float(jnp.max(jnp.abs(out - ref)))
            raise SystemExit(f"Pallas mismatch in config {idx}: max abs err {err}")
    print("KERNEL_OK")
</pallas_src>

<mosaic_0001>
module attributes {stable_mosaic.version = 11 : i64} {
  func.func @kernel(%arg0: i32, %arg1: i32, %arg2: memref<1x18x18x8xf32, #tpu.memory_space<vmem>>, %arg3: memref<8x32xf32, #tpu.memory_space<vmem>>, %arg4: memref<1x32xf32, #tpu.memory_space<vmem>>, %arg5: memref<9x32xf32, #tpu.memory_space<vmem>>, %arg6: memref<1x32xf32, #tpu.memory_space<vmem>>, %arg7: memref<32x8xf32, #tpu.memory_space<vmem>>, %arg8: memref<1x8xf32, #tpu.memory_space<vmem>>, %arg9: memref<1x8x16x8xf32, #tpu.memory_space<vmem>>, %arg10: memref<10x18x32xf32, #tpu.memory_space<vmem>>) attributes {dimension_semantics = [#tpu.dimension_semantics<parallel>, #tpu.dimension_semantics<parallel>], iteration_bounds = array<i64: 2, 2>, scalar_prefetch = 0 : i64, scratch_operands = 1 : i64, tpu.core_type = #tpu.core_type<tc>, window_params = [{transform_indices = @transform_0, window_bounds = array<i64: 1, 18, 18, 8>}, {pipeline_mode = #tpu.pipeline_mode<synchronous>, transform_indices = @transform_1, window_bounds = array<i64: 8, 32>}, {pipeline_mode = #tpu.pipeline_mode<synchronous>, transform_indices = @transform_2, window_bounds = array<i64: 1, 32>}, {pipeline_mode = #tpu.pipeline_mode<synchronous>, transform_indices = @transform_3, window_bounds = array<i64: 9, 32>}, {pipeline_mode = #tpu.pipeline_mode<synchronous>, transform_indices = @transform_4, window_bounds = array<i64: 1, 32>}, {pipeline_mode = #tpu.pipeline_mode<synchronous>, transform_indices = @transform_5, window_bounds = array<i64: 32, 8>}, {pipeline_mode = #tpu.pipeline_mode<synchronous>, transform_indices = @transform_6, window_bounds = array<i64: 1, 8>}, {transform_indices = @transform_7, window_bounds = array<i64: 1, 8, 16, 8>}]} {
    %c8_i32 = arith.constant 8 : i32
    %0 = arith.muli %arg1, %c8_i32 : i32
    %c1_i32 = arith.constant 1 : i32
    %1 = arith.muli %0, %c1_i32 : i32
    %2 = tpu.assume_multiple %1, 8 : i32
    %c0 = arith.constant 0 : index
    %3 = arith.index_cast %2 : i32 to index
    %c0_0 = arith.constant 0 : index
    %c0_1 = arith.constant 0 : index
    %4 = vector.load %arg2[%c0, %3, %c0_0, %c0_1] : memref<1x18x18x8xf32, #tpu.memory_space<vmem>>, vector<1x10x18x8xf32>
    %5 = vector.shape_cast %4 : vector<1x10x18x8xf32> to vector<10x18x8xf32>
    %6 = vector.shape_cast %5 : vector<10x18x8xf32> to vector<180x8xf32>
    %c0_2 = arith.constant 0 : index
    %c0_3 = arith.constant 0 : index
    %7 = vector.load %arg3[%c0_2, %c0_3] : memref<8x32xf32, #tpu.memory_space<vmem>>, vector<8x32xf32>
    %cst = arith.constant dense<0.000000e+00> : vector<180x32xf32>
    %8 = tpu.matmul %6, %7, %cst {dimension_numbers = #tpu.dot_dimension_numbers<[1], [0], [0], [1], [0, 0, 1, 1], [], []>} : vector<180x8xf32>, vector<8x32xf32>, vector<180x32xf32> -> vector<180x32xf32>
    %c0_4 = arith.constant 0 : index
    %c0_5 = arith.constant 0 : index
    %9 = vector.load %arg4[%c0_4, %c0_5] : memref<1x32xf32, #tpu.memory_space<vmem>>, vector<1x32xf32>
    %10 = vector.broadcast %9 : vector<1x32xf32> to vector<180x32xf32>
    %11 = arith.addf %8, %10 : vector<180x32xf32>
    %cst_6 = arith.constant 0.000000e+00 : f32
    %cst_7 = arith.constant 6.000000e+00 : f32
    %12 = vector.broadcast %cst_6 : f32 to vector<180x32xf32>
    %13 = arith.maximumf %12, %11 : vector<180x32xf32>
    %14 = vector.broadcast %cst_7 : f32 to vector<180x32xf32>
    %15 = arith.minimumf %14, %13 : vector<180x32xf32>
    %16 = vector.shape_cast %15 : vector<180x32xf32> to vector<10x18x32xf32>
    %17 = tpu.iota {dimensions = array<i32: 0>} : vector<10x18x1xi32>
    %18 = tpu.iota {dimensions = array<i32: 1>} : vector<10x18x1xi32>
    %c1_i32_8 = arith.constant 1 : i32
    %19 = arith.subi %2, %c1_i32_8 : i32
    %20 = vector.broadcast %19 : i32 to vector<10x18x1xi32>
    %21 = arith.addi %20, %17 : vector<10x18x1xi32>
    %c0_i32 = arith.constant 0 : i32
    %22 = vector.broadcast %c0_i32 : i32 to vector<10x18x1xi32>
    %23 = arith.cmpi sge, %21, %22 : vector<10x18x1xi32>
    %c16_i32 = arith.constant 16 : i32
    %24 = vector.broadcast %c16_i32 : i32 to vector<10x18x1xi32>
    %25 = arith.cmpi slt, %21, %24 : vector<10x18x1xi32>
    %26 = arith.andi %23, %25 : vector<10x18x1xi1>
    %c1_i32_9 = arith.constant 1 : i32
    %27 = vector.broadcast %c1_i32_9 : i32 to vector<10x18x1xi32>
    %28 = arith.cmpi sge, %18, %27 : vector<10x18x1xi32>
    %29 = arith.andi %26, %28 : vector<10x18x1xi1>
    %c16_i32_10 = arith.constant 16 : i32
    %30 = vector.broadcast %c16_i32_10 : i32 to vector<10x18x1xi32>
    %31 = arith.cmpi sle, %18, %30 : vector<10x18x1xi32>
    %32 = arith.andi %29, %31 : vector<10x18x1xi1>
    %cst_11 = arith.constant 0.000000e+00 : f32
    %33 = vector.shape_cast %32 : vector<10x18x1xi1> to vector<10x18x1xi1>
    %34 = vector.broadcast %33 : vector<10x18x1xi1> to vector<10x18x32xi1>
    %35 = vector.broadcast %cst_11 : f32 to vector<10x18x32xf32>
    %36 = arith.select %34, %16, %35 : vector<10x18x32xi1>, vector<10x18x32xf32>
    %c0_12 = arith.constant 0 : index
    %c0_13 = arith.constant 0 : index
    %c0_14 = arith.constant 0 : index
    %37 = vector.load %arg10[%c0_12, %c0_13, %c0_14] : memref<10x18x32xf32, #tpu.memory_space<vmem>>, vector<10x18x32xf32>
    tpu.vector_store %arg10[%c0_12, %c0_13, %c0_14], %36 {strides = array<i32>} : memref<10x18x32xf32, #tpu.memory_space<vmem>>, vector<10x18x32xf32>,
    %c0_15 = arith.constant 0 : index
    %c0_16 = arith.constant 0 : index
    %38 = vector.load %arg5[%c0_15, %c0_16] : memref<9x32xf32, #tpu.memory_space<vmem>>, vector<1x32xf32>
    %39 = vector.shape_cast %38 : vector<1x32xf32> to vector<1x1x32xf32>
    %c1 = arith.constant 1 : index
    %c0_17 = arith.constant 0 : index
    %40 = vector.load %arg5[%c1, %c0_17] : memref<9x32xf32, #tpu.memory_space<vmem>>, vector<1x32xf32>
    %41 = vector.shape_cast %40 : vector<1x32xf32> to vector<1x1x32xf32>
    %c2 = arith.constant 2 : index
    %c0_18 = arith.constant 0 : index
    %42 = vector.load %arg5[%c2, %c0_18] : memref<9x32xf32, #tpu.memory_space<vmem>>, vector<1x32xf32>
    %43 = vector.shape_cast %42 : vector<1x32xf32> to vector<1x1x32xf32>
    %c3 = arith.constant 3 : index
    %c0_19 = arith.constant 0 : index
    %44 = vector.load %arg5[%c3, %c0_19] : memref<9x32xf32, #tpu.memory_space<vmem>>, vector<1x32xf32>
    %45 = vector.shape_cast %44 : vector<1x32xf32> to vector<1x1x32xf32>
    %c4 = arith.constant 4 : index
    %c0_20 = arith.constant 0 : index
    %46 = vector.load %arg5[%c4, %c0_20] : memref<9x32xf32, #tpu.memory_space<vmem>>, vector<1x32xf32>
    %47 = vector.shape_cast %46 : vector<1x32xf32> to vector<1x1x32xf32>
    %c5 = arith.constant 5 : index
    %c0_21 = arith.constant 0 : index
    %48 = vector.load %arg5[%c5, %c0_21] : memref<9x32xf32, #tpu.memory_space<vmem>>, vector<1x32xf32>
    %49 = vector.shape_cast %48 : vector<1x32xf32> to vector<1x1x32xf32>
    %c6 = arith.constant 6 : index
    %c0_22 = arith.constant 0 : index
    %50 = vector.load %arg5[%c6, %c0_22] : memref<9x32xf32, #tpu.memory_space<vmem>>, vector<1x32xf32>
    %51 = vector.shape_cast %50 : vector<1x32xf32> to vector<1x1x32xf32>
    %c7 = arith.constant 7 : index
    %c0_23 = arith.constant 0 : index
    %52 = vector.load %arg5[%c7, %c0_23] : memref<9x32xf32, #tpu.memory_space<vmem>>, vector<1x32xf32>
    %53 = vector.shape_cast %52 : vector<1x32xf32> to vector<1x1x32xf32>
    %c8 = arith.constant 8 : index
    %c0_24 = arith.constant 0 : index
    %54 = vector.load %arg5[%c8, %c0_24] : memref<9x32xf32, #tpu.memory_space<vmem>>, vector<1x32xf32>
    %55 = vector.shape_cast %54 : vector<1x32xf32> to vector<1x1x32xf32>
    %cst_25 = arith.constant 0.000000e+00 : f32
    %56 = vector.broadcast %cst_25 : f32 to vector<8x16x32xf32>
    %c0_26 = arith.constant 0 : index
    %c0_27 = arith.constant 0 : index
    %c0_28 = arith.constant 0 : index
    %57 = vector.load %arg10[%c0_26, %c0_27, %c0_28] : memref<10x18x32xf32, #tpu.memory_space<vmem>>, vector<8x16x32xf32>
    %58 = vector.broadcast %39 : vector<1x1x32xf32> to vector<8x16x32xf32>
    %59 = arith.mulf %57, %58 : vector<8x16x32xf32>
    %60 = arith.addf %56, %59 : vector<8x16x32xf32>
    %c0_29 = arith.constant 0 : index
    %c1_30 = arith.constant 1 : index
    %c0_31 = arith.constant 0 : index
    %61 = vector.load %arg10[%c0_29, %c1_30, %c0_31] : memref<10x18x32xf32, #tpu.memory_space<vmem>>, vector<8x16x32xf32>
    %62 = vector.broadcast %41 : vector<1x1x32xf32> to vector<8x16x32xf32>
    %63 = arith.mulf %61, %62 : vector<8x16x32xf32>
    %64 = arith.addf %60, %63 : vector<8x16x32xf32>
    %c0_32 = arith.constant 0 : index
    %c2_33 = arith.constant 2 : index
    %c0_34 = arith.constant 0 : index
    %65 = vector.load %arg10[%c0_32, %c2_33, %c0_34] : memref<10x18x32xf32, #tpu.memory_space<vmem>>, vector<8x16x32xf32>
    %66 = vector.broadcast %43 : vector<1x1x32xf32> to vector<8x16x32xf32>
    %67 = arith.mulf %65, %66 : vector<8x16x32xf32>
    %68 = arith.addf %64, %67 : vector<8x16x32xf32>
    %c1_35 = arith.constant 1 : index
    %c0_36 = arith.constant 0 : index
    %c0_37 = arith.constant 0 : index
    %69 = vector.load %arg10[%c1_35, %c0_36, %c0_37] : memref<10x18x32xf32, #tpu.memory_space<vmem>>, vector<8x16x32xf32>
    %70 = vector.broadcast %45 : vector<1x1x32xf32> to vector<8x16x32xf32>
    %71 = arith.mulf %69, %70 : vector<8x16x32xf32>
    %72 = arith.addf %68, %71 : vector<8x16x32xf32>
    %c1_38 = arith.constant 1 : index
    %c1_39 = arith.constant 1 : index
    %c0_40 = arith.constant 0 : index
    %73 = vector.load %arg10[%c1_38, %c1_39, %c0_40] : memref<10x18x32xf32, #tpu.memory_space<vmem>>, vector<8x16x32xf32>
    %74 = vector.broadcast %47 : vector<1x1x32xf32> to vector<8x16x32xf32>
    %75 = arith.mulf %73, %74 : vector<8x16x32xf32>
    %76 = arith.addf %72, %75 : vector<8x16x32xf32>
    %c1_41 = arith.constant 1 : index
    %c2_42 = arith.constant 2 : index
    %c0_43 = arith.constant 0 : index
    %77 = vector.load %arg10[%c1_41, %c2_42, %c0_43] : memref<10x18x32xf32, #tpu.memory_space<vmem>>, vector<8x16x32xf32>
    %78 = vector.broadcast %49 : vector<1x1x32xf32> to vector<8x16x32xf32>
    %79 = arith.mulf %77, %78 : vector<8x16x32xf32>
    %80 = arith.addf %76, %79 : vector<8x16x32xf32>
    %c2_44 = arith.constant 2 : index
    %c0_45 = arith.constant 0 : index
    %c0_46 = arith.constant 0 : index
    %81 = vector.load %arg10[%c2_44, %c0_45, %c0_46] : memref<10x18x32xf32, #tpu.memory_space<vmem>>, vector<8x16x32xf32>
    %82 = vector.broadcast %51 : vector<1x1x32xf32> to vector<8x16x32xf32>
    %83 = arith.mulf %81, %82 : vector<8x16x32xf32>
    %84 = arith.addf %80, %83 : vector<8x16x32xf32>
    %c2_47 = arith.constant 2 : index
    %c1_48 = arith.constant 1 : index
    %c0_49 = arith.constant 0 : index
    %85 = vector.load %arg10[%c2_47, %c1_48, %c0_49] : memref<10x18x32xf32, #tpu.memory_space<vmem>>, vector<8x16x32xf32>
    %86 = vector.broadcast %53 : vector<1x1x32xf32> to vector<8x16x32xf32>
    %87 = arith.mulf %85, %86 : vector<8x16x32xf32>
    %88 = arith.addf %84, %87 : vector<8x16x32xf32>
    %c2_50 = arith.constant 2 : index
    %c2_51 = arith.constant 2 : index
    %c0_52 = arith.constant 0 : index
    %89 = vector.load %arg10[%c2_50, %c2_51, %c0_52] : memref<10x18x32xf32, #tpu.memory_space<vmem>>, vector<8x16x32xf32>
    %90 = vector.broadcast %55 : vector<1x1x32xf32> to vector<8x16x32xf32>
    %91 = arith.mulf %89, %90 : vector<8x16x32xf32>
    %92 = arith.addf %88, %91 : vector<8x16x32xf32>
    %c0_53 = arith.constant 0 : index
    %c0_54 = arith.constant 0 : index
    %93 = vector.load %arg6[%c0_53, %c0_54] : memref<1x32xf32, #tpu.memory_space<vmem>>, vector<1x32xf32>
    %94 = vector.shape_cast %93 : vector<1x32xf32> to vector<1x1x32xf32>
    %95 = vector.broadcast %94 : vector<1x1x32xf32> to vector<8x16x32xf32>
    %96 = arith.addf %92, %95 : vector<8x16x32xf32>
    %cst_55 = arith.constant 0.000000e+00 : f32
    %cst_56 = arith.constant 6.000000e+00 : f32
    %97 = vector.broadcast %cst_55 : f32 to vector<8x16x32xf32>
    %98 = arith.maximumf %97, %96 : vector<8x16x32xf32>
    %99 = vector.broadcast %cst_56 : f32 to vector<8x16x32xf32>
    %100 = arith.minimumf %99, %98 : vector<8x16x32xf32>
    %101 = vector.shape_cast %100 : vector<8x16x32xf32> to vector<128x32xf32>
    %c0_57 = arith.constant 0 : index
    %c0_58 = arith.constant 0 : index
    %102 = vector.load %arg7[%c0_57, %c0_58] : memref<32x8xf32, #tpu.memory_space<vmem>>, vector<32x8xf32>
    %cst_59 = arith.constant dense<0.000000e+00> : vector<128x8xf32>
    %103 = tpu.matmul %101, %102, %cst_59 {dimension_numbers = #tpu.dot_dimension_numbers<[1], [0], [0], [1], [0, 0, 1, 1], [], []>} : vector<128x32xf32>, vector<32x8xf32>, vector<128x8xf32> -> vector<128x8xf32>
    %c0_60 = arith.constant 0 : index
    %c0_61 = arith.constant 0 : index
    %104 = vector.load %arg8[%c0_60, %c0_61] : memref<1x8xf32, #tpu.memory_space<vmem>>, vector<1x8xf32>
    %105 = vector.broadcast %104 : vector<1x8xf32> to vector<128x8xf32>
    %106 = arith.addf %103, %105 : vector<128x8xf32>
    %c1_i32_62 = arith.constant 1 : i32
    %107 = arith.addi %2, %c1_i32_62 : i32
    %c0_63 = arith.constant 0 : index
    %108 = arith.index_cast %107 : i32 to index
    %c1_64 = arith.constant 1 : index
    %c0_65 = arith.constant 0 : index
    %109 = vector.load %arg2[%c0_63, %108, %c1_64, %c0_65] : memref<1x18x18x8xf32, #tpu.memory_space<vmem>>, vector<1x8x16x8xf32>
    %110 = vector.shape_cast %109 : vector<1x8x16x8xf32> to vector<8x16x8xf32>
    %111 = vector.shape_cast %110 : vector<8x16x8xf32> to vector<128x8xf32>
    %112 = arith.addf %106, %111 : vector<128x8xf32>
    %113 = vector.shape_cast %112 : vector<128x8xf32> to vector<8x16x8xf32>
    %c0_66 = arith.constant 0 : index
    %c0_67 = arith.constant 0 : index
    %c0_68 = arith.constant 0 : index
    %c0_69 = arith.constant 0 : index
    %114 = vector.load %arg9[%c0_66, %c0_67, %c0_68, %c0_69] : memref<1x8x16x8xf32, #tpu.memory_space<vmem>>, vector<1x8x16x8xf32>
    %115 = vector.shape_cast %114 : vector<1x8x16x8xf32> to vector<8x16x8xf32>
    %116 = vector.shape_cast %113 : vector<8x16x8xf32> to vector<1x8x16x8xf32>
    tpu.vector_store %arg9[%c0_66, %c0_67, %c0_68, %c0_69], %116 {strides = array<i32>} : memref<1x8x16x8xf32, #tpu.memory_space<vmem>>, vector<1x8x16x8xf32>,
    return
  }
  func.func @transform_0(%arg0: i32, %arg1: i32) -> (i32, i32, i32, i32) {
    %c0_i32 = arith.constant 0 : i32
    %c0_i32_0 = arith.constant 0 : i32
    %c0_i32_1 = arith.constant 0 : i32
    %c0_i32_2 = arith.constant 0 : i32
    return %arg0, %c0_i32, %c0_i32_0, %c0_i32_1 : i32, i32, i32, i32
  }
  func.func @transform_1(%arg0: i32, %arg1: i32) -> (i32, i32) {
    %c0_i32 = arith.constant 0 : i32
    %c0_i32_0 = arith.constant 0 : i32
    %c0_i32_1 = arith.constant 0 : i32
    return %c0_i32, %c0_i32_0 : i32, i32
  }
  func.func @transform_2(%arg0: i32, %arg1: i32) -> (i32, i32) {
    %c0_i32 = arith.constant 0 : i32
    %c0_i32_0 = arith.constant 0 : i32
    %c0_i32_1 = arith.constant 0 : i32
    return %c0_i32, %c0_i32_0 : i32, i32
  }
  func.func @transform_3(%arg0: i32, %arg1: i32) -> (i32, i32) {
    %c0_i32 = arith.constant 0 : i32
    %c0_i32_0 = arith.constant 0 : i32
    %c0_i32_1 = arith.constant 0 : i32
    return %c0_i32, %c0_i32_0 : i32, i32
  }
  func.func @transform_4(%arg0: i32, %arg1: i32) -> (i32, i32) {
    %c0_i32 = arith.constant 0 : i32
    %c0_i32_0 = arith.constant 0 : i32
    %c0_i32_1 = arith.constant 0 : i32
    return %c0_i32, %c0_i32_0 : i32, i32
  }
  func.func @transform_5(%arg0: i32, %arg1: i32) -> (i32, i32) {
    %c0_i32 = arith.constant 0 : i32
    %c0_i32_0 = arith.constant 0 : i32
    %c0_i32_1 = arith.constant 0 : i32
    return %c0_i32, %c0_i32_0 : i32, i32
  }
  func.func @transform_6(%arg0: i32, %arg1: i32) -> (i32, i32) {
    %c0_i32 = arith.constant 0 : i32
    %c0_i32_0 = arith.constant 0 : i32
    %c0_i32_1 = arith.constant 0 : i32
    return %c0_i32, %c0_i32_0 : i32, i32
  }
  func.func @transform_7(%arg0: i32, %arg1: i32) -> (i32, i32, i32, i32) {
    %c0_i32 = arith.constant 0 : i32
    %c0_i32_0 = arith.constant 0 : i32
    %c0_i32_1 = arith.constant 0 : i32
    return %arg0, %arg1, %c0_i32, %c0_i32_0 : i32, i32, i32, i32
  }
}

</mosaic_0001>

<bundles_post_ra>
// kernel: tpu_custom_call.1
= control target key start
LH: loop header
LB: loop body
LE: loop exit
PB: predicated region body
PF: predicated region fallthrough
CT: control target
= control target key end

     0   :  { %s3801_s24 = smov 0   ;;  %s3803_s25 = smov 0   ;;  %s5071_s0 = inlined_call_operand.vmem [shape: f32[2,18,18,8], index: 0, kind: input, shape index: {}]   ;;  %s5072_s1 = inlined_call_operand.vmem [shape: f32[8,32], index: 1, kind: input, shape index: {}]   ;;  %s5073_s2 = inlined_call_operand.vmem [shape: f32[1,32], index: 2, kind: input, shape index: {}]   ;;  %s5074_s3 = inlined_call_operand.vmem [shape: f32[9,32], index: 3, kind: input, shape index: {}]   ;;  %s5075_s4 = inlined_call_operand.vmem [shape: f32[1,32], index: 4, kind: input, shape index: {}]   ;;  %s5076_s5 = inlined_call_operand.vmem [shape: f32[32,8], index: 5, kind: input, shape index: {}]   ;;  %s5077_s6 = inlined_call_operand.vmem [shape: f32[1,8], index: 6, kind: input, shape index: {}]   ;;  %s5078_s7 = inlined_call_operand.vmem [shape: f32[2,16,16,8], index: 7, kind: output, shape index: {}]  }
   0x1   :  { %s3805_s26 = smov 0   ;;  %s3807_s27 = smov 0  }
   0x2   :  { %s3809_s28 = smov 0  }
   0x3 LB: > { %s26_s29 = sadd.s32 1, %s3748_s26  ;;  %s29_s30 = sadd.s32 1, %s3752_s27  ;;  %s3756_s28 = sphi %s3809_s28, %s17_s28   ;;  %s3752_s27 = sphi %s3807_s27, %s5134_s27   ;;  %s3748_s26 = sphi %s3805_s26, %s5133_s26   ;;  %s3744_s25 = sphi %s3803_s25, %s5132_s25   ;;  %s3740_s24 = sphi %s3801_s24, %s5131_s24  }
   0x4   : > { %p27_p0 = scmp.ge.s32.totalorder %s26_s29, 2  ;;  %p3407_p1 = scmp.ge.s32.totalorder %s3756_s28, 1 }
   0x5   : > { %p251_p2 = scmp.lt.s32.totalorder %s3756_s28, 5 }
   0x6   : > { %s5136_s29 = smov (%p27_p0, %s26_s29), 0  ;;  %s5138_s30 = smov (!%p27_p0, %s29_s30), %s3752_s27 }
   0x7   : > { %p252_p3 = pnand %p3407_p1, %p251_p2  ;;  %p31_p4 = scmp.ge.s32.totalorder %s5138_s30, 2 }
   0x8   : > { %v777_v0 = vld [vmem:[%s5072_s1] sm:$0xff] (!%p252_p3)  ;;  %p288_p5 = scmp.lt.s32.totalorder (!%p252_p3), %s3744_s25, 1  ;;  %v371_v1 = vlaneseq (!%p252_p3)  ;;  %v3758_v2 = vmov (!%p252_p3), 0.0   ;;  %vm3759_vm0 = vmmov (!%p252_p3), 0   ;;  %v3760_v3 = vmov (!%p252_p3), 1983009808  }
   0x9   : > { %s5140_s30 = smov (%p31_p4, %s5138_s30), 0  ;;  %255 = sbr.rel (%p252_p3) target bundleno = 649 (0x289), region = 48 }
   0xa   : > { %3541 = vmatprep.subr.mxu0 (!%p252_p3), %v3758_v2  ;;  %3543 = vmatprep.mubr.msk.f32.mxu0 (!%p252_p3), %vm3759_vm0, %v3758_v2  ;;  %v369_v4 = vunpack.c.l.s4 (!%p252_p3), %v3760_v3  ;;  %v3841_v5 = vshrl.u32 (!%p252_p3), %v371_v1, 7  ;;  %s3414_s10 = smul.u32 (!%p252_p3), 192, %s3740_s24  ;;  %vm1167_vm1 = vcmask (!%p252_p3), 64512   ;;  %vm2486_vm6 = vcmask (!%p252_p3), 261120  }
   0xb   : > { %3542 = vmatpush3.msra.mxu0 (!%p252_p3), %v777_v0  ;;  %3652 = vmatprep.subr.mxu1 (!%p252_p3), %v3758_v2  ;;  %vm2489_vm7 = vcmask (!%p252_p3), 254976  }
   0xc   : > { %3653 = vmatpush3.msra.mxu1 (!%p252_p3), %v777_v0  ;;  %3591 = vmatprep.mubr.msk.f32.mxu1 (!%p252_p3), %vm3759_vm0, %v3758_v2  ;;  %v370_v6 = vunpack.c.0.s8 (!%p252_p3), %v369_v4  ;;  %vm1890_vm4 = vcmp.ge.s32.totalorder (!%p252_p3), %v3841_v5, 1 }
   0xe   : > { %v3852_v7 = vsub.s32 (!%p252_p3), %v370_v6, %v3841_v5 }
  0x10   : > { %s5142_s25 = smov (!%p288_p5, %s3744_s25), 1 }
  0x11   : > { %s3654_s11 = smul.u32 432, %s5142_s25  ;;  %s3411_s18 = sshll.u32 %s5142_s25, 5 }
  0x13   : > { %s292_s14 = scalar_lea.vmem %s5071_s0, %s3654_s11 }
  0x14   : > { %s3854_s15 = scalar_lea.vmem %s292_s14, %s3414_s10  ;;  %s4063_s10 = sshll.u32 %s3740_s24, 3 }
  0x15   : > { %v307_v8 = vld [vmem:[%s3854_s15] sm:$0xff]  ;;  %v308_v9 = vld [vmem:[%s3854_s15 + $0x8] sm:$0xff]  ;;  %v310_v14 = vld [vmem:[%s3854_s15 + $0x18] sm:$0xff]  ;;  %s3449_s11 = sadd.s32 4294967295, %s4063_s10  ;;  %p296_p6 = scmp.lt.s32.totalorder %s4063_s10, 15 }
  0x16   : > { %v367_v10 = vcombine.high %v307_v8, %v307_v8  ;;  %v374_v11 = vrot.slane %v307_v8, %v3852_v7  ;;  %v384_v12 = vcombine.high %v308_v9, %v308_v9  ;;  %v391_v13 = vrot.slane %v308_v9, %v3852_v7  ;;  %v311_v15 = vld [vmem:[%s3854_s15 + $0x20] sm:$0xff]  ;;  %v3415_v23 = vld.sshfl [vmem:[%s3854_s15 + $0x10] sm:$0x3 pattern:$0x76325410]  ;;  %v314_v44 = vld [vmem:[%s3854_s15 + $0x38] sm:$0xff] }
  0x17   : > { %v408_v16 = vcombine.high %v310_v14, %v310_v14  ;;  %v415_v17 = vrot.slane %v310_v14, %v3852_v7  ;;  %v425_v18 = vcombine.high %v311_v15, %v311_v15  ;;  %v432_v26 = vrot.slane %v311_v15, %v3852_v7  ;;  %v313_v32 = vld [vmem:[%s3854_s15 + $0x30] sm:$0xff]  ;;  %v316_v47 = vld [vmem:[%s3854_s15 + $0x48] sm:$0xff]  ;;  %v3417_v6 = vld.sshfl [vmem:[%s3854_s15 + $0x40] sm:$0x3 pattern:$0x76325410] }
  0x18   : > { %v381_v19 = vrot.slane %v367_v10, %v3852_v7  ;;  %v382_v20 = vcombine.high %v374_v11, %v374_v11  ;;  %v398_v21 = vrot.slane %v384_v12, %v3852_v7  ;;  %v399_v22 = vcombine.high %v391_v13, %v391_v13  ;;  %v3416_v49 = vld.sshfl [vmem:[%s3854_s15 + $0x28] sm:$0x3 pattern:$0x76325410]  ;;  %v317_v0 = vld [vmem:[%s3854_s15 + $0x50] sm:$0xff]  ;;  %v319_v9 = vld [vmem:[%s3854_s15 + $0x60] sm:$0xff] }
  0x19   : > { %v422_v24 = vrot.slane %v408_v16, %v3852_v7  ;;  %v423_v25 = vcombine.high %v415_v17, %v415_v17  ;;  %v819_v31 = vcombine.low %v3415_v23, %v415_v17  ;;  %v439_v36 = vrot.slane %v425_v18, %v3852_v7  ;;  %s5144_s10 = smov (!%p296_p6, %s4063_s10), 15 }
  0x1a   : > { %v383_v27 = vcombine.high %v381_v19, %v381_v19  ;;  %v785_v28 = vcombine.low %v374_v11, %v382_v20  ;;  %v400_v29 = vcombine.high %v398_v21, %v398_v21  ;;  %v802_v30 = vcombine.low %v391_v13, %v399_v22  ;;  %v320_v20 = vld [vmem:[%s3854_s15 + $0x68] sm:$0xff]  ;;  %s3410_s17 = sshll.u32 %s5144_s10, 1 }
  0x1b   : > { %v820_v38 = vcombine.low %v423_v25, %v422_v24  ;;  %v424_v39 = vcombine.high %v422_v24, %v422_v24  ;;  %v440_v40 = vcombine.high %v432_v26, %v432_v26  ;;  %v456_v43 = vrot.slane %v313_v32, %v3852_v7  ;;  %s300_s19 = sadd.s32 %s3411_s18, %s3410_s17 }
  0x1c   : > { %v786_v33 = vcombine.low %v381_v19, %v383_v27  ;;  %v793_v34 = vrot.slane %v785_v28, %v3852_v7  ;;  %v803_v35 = vcombine.low %v398_v21, %v400_v29  ;;  %v810_v37 = vrot.slane %v802_v30, %v3852_v7  ;;  %v328_v27 = vld [vmem:[%s3854_s15 + $0xa8] sm:$0xff]  ;;  %s3412_s22 = sshll.u32 %s300_s19, 3 }
  0x1d   : > { %v449_v45 = vcombine.high %v313_v32, %v313_v32  ;;  %v441_v46 = vcombine.high %v439_v36, %v439_v36  ;;  %v464_v50 = vcombine.high %v456_v43, %v456_v43  ;;  %v827_v52 = vrot.slane %v819_v31, %v3852_v7  ;;  %s4993_s10 = scalar_lea.vmem %s5078_s7, %s3412_s22 }
  0x1e   : > { %v800_v41 = vrot.slane %v786_v33, %v3852_v7  ;;  %v817_v42 = vrot.slane %v803_v35, %v3852_v7  ;;  %v834_v53 = vrot.slane %v820_v38, %v3852_v7  ;;  %v473_v54 = vrot.slane %v314_v44, %v3852_v7 }
  0x1f   : > { %v463_v51 = vrot.slane %v449_v45, %v3852_v7  ;;  %v466_v55 = vcombine.high %v314_v44, %v314_v44  ;;  %v836_v57 = vcombine.low %v424_v39, %v432_v26  ;;  %v837_v58 = vcombine.low %v440_v40, %v439_v36  ;;  %v329_v36 = vld [vmem:[%s3854_s15 + $0xb0] sm:$0xff]  ;;  %v3418_v45 = vld.sshfl [vmem:[%s3854_s15 + $0x58] sm:$0x3 pattern:$0x76325410] }
  0x20   : > { %v801_v48 = vcombine.low %v793_v34, %v800_v41  ;;  %v818_v56 = vcombine.low %v810_v37, %v817_v42  ;;  %v490_v59 = vcombine.high %v316_v47, %v316_v47  ;;  %v853_v60 = vcombine.low %v441_v46, %v3416_v49 }
  0x21   : > { %v854_v61 = vcombine.low %v456_v43, %v464_v50  ;;  %v465_v62 = vcombine.high %v463_v51, %v463_v51  ;;  %v480_v63 = vrot.slane %v466_v55, %v3852_v7  ;;  %v481_v1 = vcombine.high %v473_v54, %v473_v54 }
  0x22   : > { %3544 = vmatmul.mubr.msk.f32.vlgmr.msra.gmra.mrb[0].mxu0 %vm1167_vm1, %v801_v48  ;;  %v497_v3 = vrot.slane %v316_v47, %v3852_v7  ;;  %v835_v4 = vcombine.low %v827_v52, %v834_v53  ;;  %v504_v8 = vrot.slane %v490_v59, %v3852_v7  ;;  %v844_v10 = vrot.slane %v836_v57, %v3852_v7 }
  0x23   : > { %3546 = vmatprep.mubr.msk.f32.mxu0 %vm3759_vm0, %v3758_v2  ;;  %v851_v11 = vrot.slane %v837_v58, %v3852_v7  ;;  %v482_v12 = vcombine.high %v480_v63, %v480_v63  ;;  %v507_v13 = vcombine.high %v317_v0, %v317_v0  ;;  %v861_v14 = vrot.slane %v853_v60, %v3852_v7  ;;  %v322_v58 = vld [vmem:[%s3854_s15 + $0x78] sm:$0xff] }
  0x24   : > { %v868_v15 = vrot.slane %v854_v61, %v3852_v7  ;;  %v870_v16 = vcombine.low %v463_v51, %v465_v62  ;;  %v871_v17 = vcombine.low %v473_v54, %v481_v1  ;;  %v888_v18 = vcombine.low %v3417_v6, %v497_v3 }
  0x25   : > { %v531_v19 = vcombine.high %v319_v9, %v319_v9  ;;  %v505_v21 = vcombine.high %v497_v3, %v497_v3  ;;  %v506_v22 = vcombine.high %v504_v8, %v504_v8  ;;  %v514_v23 = vrot.slane %v317_v0, %v3852_v7 }
  0x26   : > { %3547 = vmatmul.mubr.msk.f32.gmra.mrb[2].mxu0 %vm1167_vm1, %v818_v56  ;;  %v852_v24 = vcombine.low %v844_v10, %v851_v11  ;;  %v887_v25 = vcombine.low %v480_v63, %v482_v12  ;;  %v521_v26 = vrot.slane %v507_v13, %v3852_v7  ;;  %v869_v28 = vcombine.low %v861_v14, %v868_v15  ;;  %v3422_v10 = vld.sshfl [vmem:[%s3854_s15 + $0xb8] sm:$0x3 pattern:$0x76325410] }
  0x27   : > { %3549 = vmatprep.mubr.msk.f32.mxu0 %vm3759_vm0, %v3758_v2  ;;  %v878_v29 = vrot.slane %v870_v16, %v3852_v7  ;;  %v522_v30 = vcombine.high %v514_v23, %v514_v23  ;;  %v548_v31 = vcombine.high %v320_v20, %v320_v20  ;;  %v885_v32 = vrot.slane %v871_v17, %v3852_v7 }
  0x28   : > { %v902_v33 = vrot.slane %v888_v18, %v3852_v7  ;;  %v538_v34 = vrot.slane %v319_v9, %v3852_v7  ;;  %v545_v35 = vrot.slane %v531_v19, %v3852_v7  ;;  %v904_v37 = vcombine.low %v505_v21, %v504_v8 }
  0x29   : > { %v905_v38 = vcombine.low %v506_v22, %v514_v23  ;;  %v654_v39 = vcombine.high %v328_v27, %v328_v27  ;;  %v3912_v40 = vrot.slane %v328_v27, %v3852_v7  ;;  %v895_v41 = vrot.slane %v887_v25, %v3852_v7  ;;  %v3419_v22 = vld.sshfl [vmem:[%s3854_s15 + $0x70] sm:$0x3 pattern:$0x76325410] }
  0x2a   : > { %3550 = vmatmul.mubr.msk.f32.gmra.mrb[4].mxu0 %vm1167_vm1, %v835_v4  ;;  %v523_v42 = vcombine.high %v521_v26, %v521_v26  ;;  %v555_v43 = vrot.slane %v320_v20, %v3852_v7  ;;  %v562_v44 = vrot.slane %v548_v31, %v3852_v7  ;;  %v3921_v46 = vcombine.low %v522_v30, %v521_v26  ;;  %v331_v4 = vld [vmem:[%s3854_s15 + $0xc0] sm:$0xff] }
  0x2b   : > { %3552 = vmatprep.mubr.msk.f32.mxu0 %vm3759_vm0, %v3758_v2  ;;  %v668_v47 = vrot.slane %v654_v39, %v3852_v7  ;;  %v669_v48 = vcombine.high %v3912_v40, %v3912_v40  ;;  %v678_v49 = vrot.slane %v329_v36, %v3852_v7  ;;  %v886_v50 = vcombine.low %v878_v29, %v885_v32  ;;  %v323_v29 = vld [vmem:[%s3854_s15 + $0x80] sm:$0xff] }
  0x2c   : > { %v546_v51 = vcombine.high %v538_v34, %v538_v34  ;;  %v547_v52 = vcombine.high %v545_v35, %v545_v35  ;;  %v671_v53 = vcombine.high %v329_v36, %v329_v36  ;;  %v912_v54 = vrot.slane %v904_v37, %v3852_v7 }
  0x2d   : > { %v919_v55 = vrot.slane %v905_v38, %v3852_v7  ;;  %v670_v56 = vcombine.high %v668_v47, %v668_v47  ;;  %v1057_v57 = vcombine.low %v669_v48, %v668_v47  ;;  %v903_v59 = vcombine.low %v895_v41, %v902_v33 }
  0x2e   : > { %3553 = vmatmul.mubr.msk.f32.gmra.mrb[6].mxu0 %vm1167_vm1, %v852_v24  ;;  %v922_v60 = vcombine.low %v523_v42, %v3418_v45  ;;  %v563_v61 = vcombine.high %v555_v43, %v555_v43  ;;  %v564_v62 = vcombine.high %v562_v44, %v562_v44  ;;  %v929_v63 = vrot.slane %v3921_v46, %v3852_v7 }
  0x2f   : > { %3555 = vmatprep.mubr.msk.f32.mxu0 %vm3759_vm0, %v3758_v2  ;;  %v1058_v0 = vcombine.low %v670_v56, %v678_v49  ;;  %v1065_v1 = vrot.slane %v1057_v57, %v3852_v7  ;;  %v685_v3 = vrot.slane %v671_v53, %v3852_v7  ;;  %v938_v6 = vcombine.low %v538_v34, %v546_v51  ;;  %v332_v34 = vld [vmem:[%s3854_s15 + $0xc8] sm:$0xff]  ;;  %v325_v51 = vld [vmem:[%s3854_s15 + $0x90] sm:$0xff] }
  0x30   : > { %v939_v8 = vcombine.low %v545_v35, %v547_v52  ;;  %v572_v9 = vcombine.high %v322_v58, %v322_v58  ;;  %v686_v11 = vcombine.high %v678_v49, %v678_v49  ;;  %v920_v12 = vcombine.low %v912_v54, %v919_v55  ;;  %v334_v52 = vld [vmem:[%s3854_s15 + $0xd8] sm:$0xff] }
  0x31   : > { %v1072_v13 = vrot.slane %v1058_v0, %v3852_v7  ;;  %v579_v14 = vrot.slane %v322_v58, %v3852_v7  ;;  %v687_v15 = vcombine.high %v685_v3, %v685_v3  ;;  %v955_v16 = vcombine.low %v555_v43, %v563_v61 }
  0x32   : > { %3556 = vmatmul.mubr.msk.f32.gmra.mrb[8].mxu0 %vm1167_vm1, %v869_v28  ;;  %v956_v17 = vcombine.low %v562_v44, %v564_v62  ;;  %v1074_v18 = vcombine.low %v686_v11, %v685_v3  ;;  %v695_v19 = vcombine.high %v331_v4, %v331_v4  ;;  %v936_v20 = vrot.slane %v922_v60, %v3852_v7 }
  0x33   : > { %3558 = vmatprep.mubr.msk.f32.mxu0 %vm3759_vm0, %v3758_v2  ;;  %v1073_v21 = vcombine.low %v1065_v1, %v1072_v13  ;;  %v1075_v23 = vcombine.low %v687_v15, %v3422_v10  ;;  %v702_v24 = vrot.slane %v331_v4, %v3852_v7  ;;  %v946_v25 = vrot.slane %v938_v6, %v3852_v7  ;;  %v3423_v6 = vld.sshfl [vmem:[%s3854_s15 + $0xd0] sm:$0x3 pattern:$0x76325410]  ;;  %v326_v10 = vld [vmem:[%s3854_s15 + $0x98] sm:$0xff] }
  0x34   : > { %v953_v26 = vrot.slane %v939_v8, %v3852_v7  ;;  %v586_v27 = vrot.slane %v572_v9, %v3852_v7  ;;  %v1082_v28 = vrot.slane %v1074_v18, %v3852_v7  ;;  %v587_v30 = vcombine.high %v579_v14, %v579_v14 }
  0x35   : > { %3592 = vmatmul.mubr.msk.f32.vlgmr.msra.gmra.mrb[0].mxu1 %vm1167_vm1, %v1073_v21  ;;  %v1089_v31 = vrot.slane %v1075_v23, %v3852_v7  ;;  %v709_v32 = vrot.slane %v695_v19, %v3852_v7  ;;  %v710_v33 = vcombine.high %v702_v24, %v702_v24  ;;  %v963_v35 = vrot.slane %v955_v16, %v3852_v7 }
  0x36   : > { %3559 = vmatmul.mubr.msk.f32.gmra.mrb[10].mxu0 %vm1167_vm1, %v886_v50  ;;  %v970_v36 = vrot.slane %v956_v17, %v3852_v7  ;;  %v972_v37 = vcombine.low %v3419_v22, %v579_v14  ;;  %3594 = vmatprep.mubr.msk.f32.mxu1 %vm3759_vm0, %v3758_v2  ;;  %v589_v39 = vcombine.high %v323_v29, %v323_v29  ;;  %v3420_v22 = vld.sshfl [vmem:[%s3854_s15 + $0x88] sm:$0x3 pattern:$0x76325410] }
  0x37   : > { %3561 = vmatprep.mubr.msk.f32.mxu0 %vm3759_vm0, %v3758_v2  ;;  %v1090_v38 = vcombine.low %v1082_v28, %v1089_v31  ;;  %v711_v41 = vcombine.high %v709_v32, %v709_v32  ;;  %v1091_v42 = vcombine.low %v702_v24, %v710_v33  ;;  %v937_v43 = vcombine.low %v929_v63, %v936_v20  ;;  %v335_v20 = vld [vmem:[%s3854_s15 + $0xe0] sm:$0xff] }
  0x38   : > { %v954_v44 = vcombine.low %v946_v25, %v953_v26  ;;  %v712_v45 = vcombine.high %v332_v34, %v332_v34  ;;  %v719_v46 = vrot.slane %v332_v34, %v3852_v7  ;;  %v973_v47 = vcombine.low %v587_v30, %v586_v27 }
  0x39   : > { %3595 = vmatmul.mubr.msk.f32.gmra.mrb[2].mxu1 %vm1167_vm1, %v1090_v38  ;;  %v596_v48 = vrot.slane %v323_v29, %v3852_v7  ;;  %v1092_v49 = vcombine.low %v709_v32, %v711_v41  ;;  %v1099_v50 = vrot.slane %v1091_v42, %v3852_v7  ;;  %v980_v53 = vrot.slane %v972_v37, %v3852_v7 }
  0x3a   : > { %3562 = vmatmul.mubr.msk.f32.gmra.mrb[12].mxu0 %vm1167_vm1, %v903_v59  ;;  %v588_v54 = vcombine.high %v586_v27, %v586_v27  ;;  %3597 = vmatprep.mubr.msk.f32.mxu1 %vm3759_vm0, %v3758_v2  ;;  %v726_v55 = vrot.slane %v712_v45, %v3852_v7  ;;  %v971_v56 = vcombine.low %v963_v35, %v970_v36  ;;  %v3424_v45 = vld.sshfl [vmem:[%s3854_s15 + $0xe8] sm:$0x3 pattern:$0x76325410] }
  0x3b   : > { %3564 = vmatprep.mubr.msk.f32.mxu0 %vm3759_vm0, %v3758_v2  ;;  %v603_v57 = vrot.slane %v589_v39, %v3852_v7  ;;  %v1106_v58 = vrot.slane %v1092_v49, %v3852_v7  ;;  %v727_v59 = vcombine.high %v719_v46, %v719_v46  ;;  %v620_v60 = vrot.slane %v325_v51, %v3852_v7 }
  0x3c   : > { %v728_v61 = vcombine.high %v726_v55, %v726_v55  ;;  %v736_v62 = vcombine.high %v334_v52, %v334_v52  ;;  %v743_v63 = vrot.slane %v334_v52, %v3852_v7  ;;  %v604_v0 = vcombine.high %v596_v48, %v596_v48 }
  0x3d   : > { %v1107_v1 = vcombine.low %v1099_v50, %v1106_v58  ;;  %v1108_v3 = vcombine.low %v719_v46, %v727_v59  ;;  %v613_v4 = vcombine.high %v325_v51, %v325_v51  ;;  %v987_v8 = vrot.slane %v973_v47, %v3852_v7 }
  0x3e   : > { %3565 = vmatmul.mubr.msk.f32.gmra.mrb[14].mxu0 %vm1167_vm1, %v920_v12  ;;  %v1109_v9 = vcombine.low %v726_v55, %v728_v61  ;;  %v750_v11 = vrot.slane %v736_v62, %v3852_v7  ;;  %v751_v12 = vcombine.high %v743_v63, %v743_v63  ;;  %v989_v13 = vcombine.low %v588_v54, %v596_v48 }
  0x3f   : > { %3567 = vmatprep.mubr.msk.f32.mxu0 %vm3759_vm0, %v3758_v2  ;;  %3598 = vmatmul.mubr.msk.f32.gmra.mrb[4].mxu1 %vm1167_vm1, %v1107_v1  ;;  %v605_v14 = vcombine.high %v603_v57, %v603_v57  ;;  %v1116_v15 = vrot.slane %v1108_v3, %v3852_v7  ;;  %v628_v16 = vcombine.high %v620_v60, %v620_v60 }
  0x40   : > { %3600 = vmatprep.mubr.msk.f32.mxu1 %vm3759_vm0, %v3758_v2  ;;  %v1123_v17 = vrot.slane %v1109_v9, %v3852_v7  ;;  %v1125_v18 = vcombine.low %v3423_v6, %v743_v63  ;;  %v1126_v19 = vcombine.low %v751_v12, %v750_v11  ;;  %v990_v21 = vcombine.low %v604_v0, %v603_v57  ;;  %v3421_v57 = vld.sshfl [vmem:[%s3854_s15 + $0xa0] sm:$0x3 pattern:$0x76325410] }
  0x41   : > { %v627_v23 = vrot.slane %v613_v4, %v3852_v7  ;;  %v637_v24 = vrot.slane %v326_v10, %v3852_v7  ;;  %v752_v25 = vcombine.high %v750_v11, %v750_v11  ;;  %v630_v29 = vcombine.high %v326_v10, %v326_v10  ;;  %v3052_v6 = vld [vmem:[%s5076_s5] sm:$0xff]  ;;  %v3054_v10 = vld [vmem:[%s5076_s5 + $0x10] sm:$0xff] }
  0x42   : > { %3568 = vmatmul.mubr.msk.f32.gmra.mrb[16].mxu0 %vm1167_vm1, %v937_v43  ;;  %v1124_v26 = vcombine.low %v1116_v15, %v1123_v17  ;;  %v1133_v27 = vrot.slane %v1125_v18, %v3852_v7  ;;  %v1140_v28 = vrot.slane %v1126_v19, %v3852_v7  ;;  %v753_v30 = vcombine.high %v335_v20, %v335_v20  ;;  %v4059_v12 = vld [vmem:[%s5073_s2] ss:$0 sm:$0xff] }
  0x43   : > { %3570 = vmatprep.mubr.msk.f32.mxu0 %vm3759_vm0, %v3758_v2  ;;  %v760_v31 = vrot.slane %v335_v20, %v3852_v7  ;;  %v988_v32 = vcombine.low %v980_v53, %v987_v8  ;;  %v1006_v33 = vcombine.low %v605_v14, %v3420_v22  ;;  %v1007_v34 = vcombine.low %v620_v60, %v628_v16  ;;  %v3053_v8 = vld [vmem:[%s5076_s5 + $0x8] sm:$0xff] }
  0x44   : > { %3601 = vmatmul.mubr.msk.f32.gmra.mrb[6].mxu1 %vm1167_vm1, %v1124_v26  ;;  %v1141_v35 = vcombine.low %v1133_v27, %v1140_v28  ;;  %v629_v36 = vcombine.high %v627_v23, %v627_v23  ;;  %v767_v37 = vrot.slane %v753_v30, %v3852_v7  ;;  %v997_v41 = vrot.slane %v989_v13, %v3852_v7 }
  0x45   : > { %3603 = vmatprep.mubr.msk.f32.mxu1 %vm3759_vm0, %v3758_v2  ;;  %v768_v38 = vcombine.high %v760_v31, %v760_v31  ;;  %v1142_v39 = vcombine.low %v752_v25, %v760_v31  ;;  %v1004_v42 = vrot.slane %v990_v21, %v3852_v7  ;;  %v645_v43 = vcombine.high %v637_v24, %v637_v24 }
  0x46   : > { %3571 = vmatmul.mubr.msk.f32.gmra.mrb[18].mxu0 %vm1167_vm1, %v954_v44  ;;  %v644_v44 = vrot.slane %v630_v29, %v3852_v7  ;;  %v769_v48 = vcombine.high %v767_v37, %v767_v37  ;;  %v1014_v49 = vrot.slane %v1006_v33, %v3852_v7  ;;  %v1021_v50 = vrot.slane %v1007_v34, %v3852_v7 }
  0x47   : > { %3573 = vmatprep.mubr.msk.f32.mxu0 %vm3759_vm0, %v3758_v2  ;;  %v1143_v46 = vcombine.low %v768_v38, %v767_v37  ;;  %v1150_v47 = vrot.slane %v1142_v39, %v3852_v7  ;;  %v1023_v51 = vcombine.low %v627_v23, %v629_v36  ;;  %v1005_v54 = vcombine.low %v997_v41, %v1004_v42 }
  0x48   : > { %3604 = vmatmul.mubr.msk.f32.gmra.mrb[8].mxu1 %vm1167_vm1, %v1141_v35  ;;  %v1159_v53 = vcombine.low %v769_v48, %v3424_v45  ;;  %v1024_v55 = vcombine.low %v637_v24, %v645_v43  ;;  %v1022_v59 = vcombine.low %v1014_v49, %v1021_v50  ;;  %v1041_v0 = vcombine.low %v3421_v57, %v3912_v40 }
  0x49   : > { %3606 = vmatprep.mubr.msk.f32.mxu1 %vm3759_vm0, %v3758_v2  ;;  %v1157_v52 = vrot.slane %v1143_v46, %v3852_v7  ;;  %v1031_v60 = vrot.slane %v1023_v51, %v3852_v7  ;;  %v3644_v9 = vpack.c.bf16 %v3053_v8, %v3052_v6  ;;  %v4068_v21 = vadd.s32 16, %v3841_v5 }
  0x4a   : > { %3574 = vmatmul.mubr.msk.f32.gmra.mrb[20].mxu0 %vm1167_vm1, %v971_v56  ;;  %v646_v56 = vcombine.high %v644_v44, %v644_v44  ;;  %v1166_v61 = vrot.slane %v1159_v53, %v3852_v7  ;;  %v1038_v62 = vrot.slane %v1024_v55, %v3852_v7  ;;  %v1055_v4 = vrot.slane %v1041_v0, %v3852_v7 }
  0x4b   : > { %3576 = vmatprep.mubr.msk.f32.mxu0 %vm3759_vm0, %v3758_v2  ;;  %v1158_v58 = vcombine.low %v1150_v47, %v1157_v52  ;;  %3645 = vmatprep.subr.bf16.mxu1 %v3644_v9  ;;  %v4071_v25 = vstv %s3449_s11  ;;  %vm1925_vm5 = vcmp.le.s32.totalorder %v4068_v21, 16 }
  0x4c   : > { %v1040_v63 = vcombine.low %v644_v44, %v646_v56  ;;  %v1039_v1 = vcombine.low %v1031_v60, %v1038_v62  ;;  %3647 = vmatpush3.bf16.msra.mxu1 %v3644_v9  ;;  %v4074_v27 = vadd.s32 1, %v4071_v25  ;;  %vm1860_vm2 = vcmp.ge.s32.totalorder %v4071_v25, 0 }
  0x4d   : > { %3607 = vmatmul.mubr.msk.f32.gmra.mrb[10].mxu1 %vm1167_vm1, %v1158_v58  ;;  %vm1870_vm3 = vcmp.lt.s32.totalorder %v4071_v25, 16  ;;  %v4096_v47 = vadd.s32 2, %v4071_v25  ;;  %v4099_v48 = vadd.s32 3, %v4071_v25  ;;  %v4113_v58 = vadd.s32 4, %v4071_v25 }
  0x4e   : > { %3577 = vmatmul.mubr.msk.f32.gmra.mrb[22].mxu0 %vm1167_vm1, %v988_v32  ;;  %3609 = vmatprep.mubr.msk.f32.mxu1 %vm3759_vm0, %v3758_v2  ;;  %v1048_v3 = vrot.slane %v1040_v63, %v3852_v7  ;;  %vm1861_vm8 = vcmp.ge.s32.totalorder %v4074_v27, 0  ;;  %vm4089_vm9 = vmand %vm1860_vm2, %vm1870_vm3  ;;  %vm1871_vm10 = vcmp.lt.s32.totalorder %v4074_v27, 16  ;;  %v4121_v63 = vadd.s32 5, %v4071_v25 }
  0x4f   : > { %3579 = vmatprep.mubr.msk.f32.mxu0 %vm3759_vm0, %v3758_v2  ;;  %vm4108_vm11 = vmand %vm4089_vm9, %vm1890_vm4  ;;  %vm1862_vm13 = vcmp.ge.s32.totalorder %v4096_v47, 0  ;;  %vm1872_vm14 = vcmp.lt.s32.totalorder %v4096_v47, 16  ;;  %vm1863_vm3 = vcmp.ge.s32.totalorder %v4099_v48, 0 }
  0x50   : > { %v1056_v40 = vcombine.low %v1048_v3, %v1055_v4  ;;  %vm1928_vm12 = vmand %vm4089_vm9, %vm1925_vm5 }
  0x51   : > { %3610 = vmatmul.mubr.msk.f32.gmra.mrb[12].mxu1 %vm1167_vm1, %v1166_v61  ;;  %vm4149_vm15 = vmand %vm1861_vm8, %vm1871_vm10  ;;  %vm1873_vm8 = vcmp.lt.s32.totalorder %v4099_v48, 16 }
  0x52   : > { %3580 = vmatmul.mubr.msk.f32.gmra.mrb[24].mxu0 %vm1167_vm1, %v1005_v54  ;;  %vm4172_vm2 = vmand %vm4149_vm15, %vm1925_vm5 }
  0x53   : > { %3582 = vmatprep.mubr.msk.f32.mxu0 %vm3759_vm0, %v3758_v2 }
  0x56   : > { %3583 = vmatmul.mubr.msk.f32.gmra.mrb[26].mxu0 %vm1167_vm1, %v1022_v59 }
  0x57   : > { %3585 = vmatprep.mubr.msk.f32.mxu0 %vm3759_vm0, %v3758_v2 }
  0x5a   : > { %3586 = vmatmul.mubr.msk.f32.gmra.mrb[28].mxu0 %vm1167_vm1, %v1039_v1 }
  0x5b   : > { %3588 = vmatprep.mubr.msk.f32.mxu0 %vm3759_vm0, %v3758_v2  ;;  %v3055_v2 = vld [vmem:[%s5076_s5 + $0x18] sm:$0xff]  ;;  %vm4163_vm0 = vmand %vm4149_vm15, %vm1890_vm4 }
  0x5c   : > { %v3648_v11 = vpack.c.bf16 %v3055_v2, %v3054_v10 }
  0x5e   : > { %3589 = vmatmul.mubr.msk.f32.gmra.mrb[30].mxu0 %vm1167_vm1, %v1056_v40  ;;  %3649 = vmatprep.subr.bf16.mxu1 %v3648_v11 }
  0x5f   : > { %3651 = vmatpush3.bf16.msra.mxu1 %v3648_v11 }
  0xf5   : > { %v1280_v13 = vpop.f32.mrb[0].mxu0 }
  0xf6   : > { %v1281_v14 = vadd.f32 %v4059_v12, %v1280_v13  ;;  %v3545_v15 = vpop.f32.mrb[1].mxu0 }
  0xf8   : > { %v1394_v16 = vmax.f32 %v1281_v14, 0.0 }
  0xf9   : > { %v1285_v17 = vpop.f32.mrb[2].mxu0 }
  0xfa   : > { %v1417_v18 = vmin.f32 %v1394_v16, 6.0  ;;  %v1286_v19 = vadd.f32 %v4059_v12, %v1285_v17  ;;  %v3548_v20 = vpop.f32.mrb[3].mxu0 }
  0xfc   : > { %v1463_v22 = vcombine.high %v1417_v18, %v1417_v18  ;;  %v1470_v23 = vrot.slane %v1417_v18, %v3852_v7  ;;  %v1395_v24 = vmax.f32 %v1286_v19, 0.0 }
  0xfd   : > { %v1290_v26 = vpop.f32.mrb[4].mxu0 }
  0xfe   : > { %v1477_v28 = vrot.slane %v1463_v22, %v3852_v7  ;;  %v1478_v29 = vcombine.high %v1470_v23, %v1470_v23  ;;  %v1418_v30 = vmin.f32 %v1395_v24, 6.0  ;;  %v1291_v31 = vadd.f32 %v4059_v12, %v1290_v26  ;;  %v3551_v32 = vpop.f32.mrb[5].mxu0 }
  0xff   : > { %v4141_v24 = vadd.s32 6, %v4071_v25 }
 0x100   : > { %v1479_v33 = vcombine.high %v1477_v28, %v1477_v28  ;;  %v2016_v34 = vcombine.low %v1470_v23, %v1478_v29  ;;  %v1480_v35 = vcombine.high %v1418_v30, %v1418_v30  ;;  %v1487_v36 = vrot.slane %v1418_v30, %v3852_v7 }
 0x101   : > { %v1396_v37 = vmax.f32 %v1291_v31, 0.0  ;;  %v1295_v38 = vpop.f32.mrb[6].mxu0  ;;  %v4138_v23 = vadd.s32 7, %v4071_v25 }
 0x102   : > { %v2017_v39 = vcombine.low %v1477_v28, %v1479_v33  ;;  %v1494_v41 = vrot.slane %v1480_v35, %v3852_v7  ;;  %v1495_v42 = vcombine.high %v1487_v36, %v1487_v36  ;;  %v3554_v44 = vpop.f32.mrb[7].mxu0  ;;  %v1296_v46 = vadd.f32 %v4059_v12, %v1295_v38 }
 0x103   : > { %v1419_v45 = vmin.f32 %v1396_v37, 6.0  ;;  %v2024_v49 = vrot.slane %v2016_v34, %v3852_v7 }
 0x104   : > { %v2031_v50 = vrot.slane %v2017_v39, %v3852_v7  ;;  %v1496_v51 = vcombine.high %v1494_v41, %v1494_v41  ;;  %v2033_v52 = vcombine.low %v1487_v36, %v1495_v42  ;;  %v1397_v56 = vmax.f32 %v1296_v46, 0.0 }
 0x105   : > { %v1497_v53 = vcombine.high %v1419_v45, %v1419_v45  ;;  %v1504_v54 = vrot.slane %v1419_v45, %v3852_v7  ;;  %v1300_v57 = vpop.f32.mrb[8].mxu0 }
 0x106   : > { %v2032_v59 = vcombine.low %v2024_v49, %v2031_v50  ;;  %v2034_v60 = vcombine.low %v1494_v41, %v1496_v51  ;;  %v1301_v61 = vadd.f32 %v4059_v12, %v1300_v57  ;;  %v3557_v62 = vpop.f32.mrb[9].mxu0  ;;  %v1420_v4 = vmin.f32 %v1397_v56, 6.0 }
 0x107   : > { %v1511_v0 = vrot.slane %v1497_v53, %v3852_v7  ;;  %v1512_v1 = vcombine.high %v1504_v54, %v1504_v54  ;;  %v2056_v3 = vrot.slane %v1504_v54, %v3852_v7  ;;  %v2041_v40 = vrot.slane %v2033_v52, %v3852_v7 }
 0x108   : > { %v2048_v6 = vrot.slane %v2034_v60, %v3852_v7  ;;  %v2456_v8 = vsel %vm4108_vm11, %v2032_v59, 0.0  ;;  %v1398_v9 = vmax.f32 %v1301_v61, 0.0  ;;  %v1514_v13 = vcombine.high %v1420_v4, %v1420_v4  ;;  %v1360_v32 = vpop.f32.mrb[0].mxu1 }
 0x109   : > { %v2057_v10 = vcombine.low %v1512_v1, %v1511_v0  ;;  %v2458_v2 = vsel %vm1928_vm12, %v2056_v3, 0.0  ;;  %2487 = vst.msk [vmem:[#allocation2] sm:$0xff] %vm2486_vm6, %v2456_v8  ;;  %v1513_v11 = vcombine.high %v1511_v0, %v1511_v0  ;;  %v1305_v14 = vpop.f32.mrb[10].mxu0  ;;  %v1521_v16 = vrot.slane %v1420_v4, %v3852_v7  ;;  %v3593_v38 = vpop.f32.mrb[1].mxu1 }
 0x10a   : > { %v2049_v15 = vcombine.low %v2041_v40, %v2048_v6  ;;  %2490 = vst.msk [vmem:[#allocation2 + $0x10] sm:$0x3] %vm2489_vm7, %v2458_v2  ;;  %v1421_v17 = vmin.f32 %v1398_v9, 6.0  ;;  %v1306_v18 = vadd.f32 %v4059_v12, %v1305_v14  ;;  %v3560_v19 = vpop.f32.mrb[11].mxu0  ;;  %v1528_v22 = vrot.slane %v1514_v13, %v3852_v7 }
 0x10b   : > { %v2065_v20 = vrot.slane %v2057_v10, %v3852_v7  ;;  %v1529_v28 = vcombine.high %v1521_v16, %v1521_v16  ;;  %v2058_v30 = vcombine.low %v1513_v11, %v1521_v16  ;;  %v1361_v37 = vadd.f32 %v4059_v12, %v1360_v32 }
 0x10c   : > { %v2457_v26 = vsel %vm4089_vm9, %v2049_v15, 0.0  ;;  %v1531_v31 = vcombine.high %v1421_v17, %v1421_v17  ;;  %v1530_v33 = vcombine.high %v1528_v22, %v1528_v22  ;;  %v1538_v34 = vrot.slane %v1421_v17, %v3852_v7  ;;  %v4176_v56 = vpop.f32.mrb[2].mxu1  ;;  %vm4195_vm9 = vmand %vm1862_vm13, %vm1872_vm14 }
 0x10d   : > { %2488 = vst.msk [vmem:[#allocation2 + $0x8] sm:$0xff] %vm2486_vm6, %v2457_v26  ;;  %v1399_v35 = vmax.f32 %v1306_v18, 0.0  ;;  %v1310_v36 = vpop.f32.mrb[12].mxu0  ;;  %v2072_v39 = vrot.slane %v2058_v30, %v3852_v7  ;;  %v2074_v27 = vcombine.low %v1529_v28, %v1528_v22  ;;  %v1410_v50 = vmax.f32 %v1361_v37, 0.0  ;;  %v3596_v0 = vpop.f32.mrb[3].mxu1  ;;  %vm1934_vm10 = vmand %vm4195_vm9, %vm1925_vm5 }
 0x10e   : > { %v1545_v41 = vrot.slane %v1531_v31, %v3852_v7  ;;  %v1311_v42 = vadd.f32 %v4059_v12, %v1310_v36  ;;  %v3563_v43 = vpop.f32.mrb[13].mxu0  ;;  %v1546_v45 = vcombine.high %v1538_v34, %v1538_v34  ;;  %v2075_v46 = vcombine.low %v1530_v33, %v1538_v34  ;;  %vm4223_vm11 = vmand %vm4195_vm9, %vm1890_vm4 }
 0x10f   : > { %v1422_v49 = vmin.f32 %v1399_v35, 6.0  ;;  %v2073_v51 = vcombine.low %v2065_v20, %v2072_v39  ;;  %v2082_v52 = vrot.slane %v2074_v27, %v3852_v7  ;;  %v4201_v16 = vadd.s32 8, %v4071_v25  ;;  %vm4245_vm14 = vmand %vm1863_vm3, %vm1873_vm8 }
 0x110   : > { %v1547_v53 = vcombine.high %v1545_v41, %v1545_v41  ;;  %v1400_v55 = vmax.f32 %v1311_v42, 0.0  ;;  %v2089_v57 = vrot.slane %v2075_v46, %v3852_v7  ;;  %v2097_v59 = vrot.slane %v1546_v45, %v3852_v7 }
 0x111   : > { %v1548_v60 = vcombine.high %v1422_v49, %v1422_v49  ;;  %v1555_v61 = vrot.slane %v1422_v49, %v3852_v7  ;;  %v1315_v62 = vpop.f32.mrb[14].mxu0  ;;  %v2459_v1 = vsel %vm4163_vm0, %v2073_v51, 0.0  ;;  %v4206_v22 = vadd.s32 9, %v4071_v25  ;;  %vm4280_vm0 = vmand %vm4245_vm14, %vm1925_vm5 }
 0x112   : > { %v2098_v3 = vcombine.low %v1545_v41, %v1547_v53  ;;  %v1423_v4 = vmin.f32 %v1400_v55, 6.0  ;;  %v1316_v40 = vadd.f32 %v4059_v12, %v1315_v62  ;;  %v3566_v6 = vpop.f32.mrb[15].mxu0  ;;  %2491 = vst.msk [vmem:[#allocation2 + $0x18] sm:$0xff] %vm2486_vm6, %v2459_v1  ;;  %v2090_v8 = vcombine.low %v2082_v52, %v2089_v57  ;;  %v4211_v32 = vpop.f32.mrb[4].mxu1 }
 0x113   : > { %v2461_v9 = vsel %vm4172_vm2, %v2097_v59, 0.0  ;;  %v1562_v10 = vrot.slane %v1548_v60, %v3852_v7  ;;  %v1563_v2 = vcombine.high %v1555_v61, %v1555_v61  ;;  %v1433_v25 = vmin.f32 %v1410_v50, 6.0  ;;  %v3599_v35 = vpop.f32.mrb[5].mxu1 }
 0x114   : > { %2493 = vst.msk [vmem:[#allocation2 + $0x28] sm:$0x3] %vm2489_vm7, %v2461_v9  ;;  %v1565_v13 = vcombine.high %v1423_v4, %v1423_v4  ;;  %v1572_v14 = vrot.slane %v1423_v4, %v3852_v7  ;;  %v1401_v15 = vmax.f32 %v1316_v40, 0.0  ;;  %v2460_v17 = vsel %vm4149_vm15, %v2090_v8, 0.0  ;;  %vm4266_vm15 = vmand %vm4245_vm14, %vm1890_vm4 }
 0x115   : > { %v1564_v18 = vcombine.high %v1562_v10, %v1562_v10  ;;  %v2099_v19 = vcombine.low %v1555_v61, %v1563_v2  ;;  %v1320_v20 = vpop.f32.mrb[16].mxu0  ;;  %2492 = vst.msk [vmem:[#allocation2 + $0x20] sm:$0xff] %vm2486_vm6, %v2460_v17  ;;  %v2106_v29 = vrot.slane %v2098_v3, %v3852_v7  ;;  %vm1864_vm12 = vcmp.ge.s32.totalorder %v4113_v58, 0 }
 0x116   : > { %v1579_v47 = vrot.slane %v1565_v13, %v3852_v7  ;;  %v1580_v26 = vcombine.high %v1572_v14, %v1572_v14  ;;  %v1424_v28 = vmin.f32 %v1401_v15, 6.0  ;;  %v1321_v30 = vadd.f32 %v4059_v12, %v1320_v20  ;;  %v3569_v31 = vpop.f32.mrb[17].mxu0 }
 0x117   : > { %v2113_v33 = vrot.slane %v2099_v19, %v3852_v7  ;;  %v2115_v34 = vcombine.low %v1562_v10, %v1564_v18  ;;  %vm1874_vm13 = vcmp.lt.s32.totalorder %v4113_v58, 16  ;;  %v4238_v59 = vpop.f32.mrb[6].mxu1  ;;  %v1735_v0 = vcombine.high %v1433_v25, %v1433_v25 }
 0x118   : > { %v2116_v37 = vcombine.low %v1572_v14, %v1580_v26  ;;  %v2138_v38 = vrot.slane %v1579_v47, %v3852_v7  ;;  %v1581_v39 = vcombine.high %v1579_v47, %v1579_v47  ;;  %v1582_v27 = vcombine.high %v1424_v28, %v1424_v28  ;;  %v3602_v1 = vpop.f32.mrb[7].mxu1 }
 0x119   : > { %v2114_v41 = vcombine.low %v2106_v29, %v2113_v33  ;;  %v2123_v42 = vrot.slane %v2115_v34, %v3852_v7  ;;  %v1589_v43 = vrot.slane %v1424_v28, %v3852_v7  ;;  %v1402_v44 = vmax.f32 %v1321_v30, 0.0  ;;  %v1325_v45 = vpop.f32.mrb[18].mxu0 }
 0x11a   : > { %v2130_v46 = vrot.slane %v2116_v37, %v3852_v7  ;;  %v2464_v49 = vsel %vm1934_vm10, %v2138_v38, 0.0  ;;  %v1596_v50 = vrot.slane %v1582_v27, %v3852_v7  ;;  %v1326_v51 = vadd.f32 %v4059_v12, %v1325_v45  ;;  %v3572_v52 = vpop.f32.mrb[19].mxu0  ;;  %vm4310_vm10 = vmand %vm1864_vm12, %vm1874_vm13 }
 0x11b   : > { %v2462_v53 = vsel %vm4223_vm11, %v2114_v41, 0.0  ;;  %2496 = vst.msk [vmem:[#allocation2 + $0x40] sm:$0x3] %vm2489_vm7, %v2464_v49  ;;  %v1597_v54 = vcombine.high %v1589_v43, %v1589_v43  ;;  %v2139_v55 = vcombine.low %v1581_v39, %v1589_v43  ;;  %v1425_v57 = vmin.f32 %v1402_v44, 6.0  ;;  %v4260_v20 = vpop.f32.mrb[8].mxu1  ;;  %vm4328_vm11 = vmand %vm4310_vm10, %vm1890_vm4 }
 0x11c   : > { %2494 = vst.msk [vmem:[#allocation2 + $0x30] sm:$0xff] %vm2486_vm6, %v2462_v53  ;;  %v2131_v60 = vcombine.low %v2123_v42, %v2130_v46  ;;  %v1598_v61 = vcombine.high %v1596_v50, %v1596_v50  ;;  %v1403_v62 = vmax.f32 %v1326_v51, 0.0  ;;  %v4251_v9 = vrot.slane %v1433_v25, %v3852_v7  ;;  %v3605_v31 = vpop.f32.mrb[9].mxu1  ;;  %vm1940_vm12 = vmand %vm4310_vm10, %vm1925_vm5 }
 0x11d   : > { %v2140_v4 = vcombine.low %v1597_v54, %v1596_v50  ;;  %v1599_v40 = vcombine.high %v1425_v57, %v1425_v57  ;;  %v1606_v6 = vrot.slane %v1425_v57, %v3852_v7  ;;  %v1330_v8 = vpop.f32.mrb[20].mxu0  ;;  %v2147_v2 = vrot.slane %v2139_v55, %v3852_v7 }
 0x11e   : > { %v2463_v10 = vsel %vm4195_vm9, %v2131_v60, 0.0  ;;  %v1426_v13 = vmin.f32 %v1403_v62, 6.0  ;;  %v1331_v48 = vadd.f32 %v4059_v12, %v1330_v8  ;;  %v3575_v14 = vpop.f32.mrb[21].mxu0  ;;  %v4272_v30 = vrot.slane %v1735_v0, %v3852_v7 }
 0x11f   : > { %2495 = vst.msk [vmem:[#allocation2 + $0x38] sm:$0xff] %vm2486_vm6, %v2463_v10  ;;  %v2154_v15 = vrot.slane %v2140_v4, %v3852_v7  ;;  %v1613_v17 = vrot.slane %v1599_v40, %v3852_v7  ;;  %v1614_v18 = vcombine.high %v1606_v6, %v1606_v6  ;;  %v2156_v19 = vcombine.low %v1598_v61, %v1606_v6 }
 0x120   : > { %v1616_v47 = vcombine.high %v1426_v13, %v1426_v13  ;;  %v1623_v26 = vrot.slane %v1426_v13, %v3852_v7  ;;  %v1404_v28 = vmax.f32 %v1331_v48, 0.0  ;;  %v1750_v35 = vcombine.high %v4251_v9, %v4251_v9  ;;  %v4295_v52 = vpop.f32.mrb[10].mxu1 }
 0x121   : > { %v2155_v29 = vcombine.low %v2147_v2, %v2154_v15  ;;  %v1615_v33 = vcombine.high %v1613_v17, %v1613_v17  ;;  %v2157_v34 = vcombine.low %v1614_v18, %v1613_v17  ;;  %v1335_v25 = vpop.f32.mrb[22].mxu0  ;;  %v2164_v43 = vrot.slane %v2156_v19, %v3852_v7  ;;  %v3608_v61 = vpop.f32.mrb[11].mxu1 }
 0x122   : > { %v1630_v37 = vrot.slane %v1616_v47, %v3852_v7  ;;  %v1631_v38 = vcombine.high %v1623_v26, %v1623_v26  ;;  %v1427_v39 = vmin.f32 %v1404_v28, 6.0  ;;  %v1336_v27 = vadd.f32 %v4059_v12, %v1335_v25  ;;  %v3578_v41 = vpop.f32.mrb[23].mxu0 }
 0x123   : > { %v2465_v42 = vsel %vm4266_vm15, %v2155_v29, 0.0  ;;  %v2171_v44 = vrot.slane %v2157_v34, %v3852_v7  ;;  %v2179_v45 = vrot.slane %v1615_v33, %v3852_v7  ;;  %vm1867_vm2 = vcmp.ge.s32.totalorder %v4138_v23, 0 }
 0x124   : > { %vm1877_vm3 = vcmp.lt.s32.totalorder %v4138_v23, 16  ;;  %2497 = vst.msk [vmem:[#allocation2 + $0x48] sm:$0xff] %vm2486_vm6, %v2465_v42  ;;  %v1632_v46 = vcombine.high %v1630_v37, %v1630_v37  ;;  %v2180_v49 = vcombine.low %v1623_v26, %v1631_v38  ;;  %v1633_v50 = vcombine.high %v1427_v39, %v1427_v39  ;;  %v4321_v15 = vpop.f32.mrb[12].mxu1 }
 0x125   : > { %v1640_v51 = vrot.slane %v1427_v39, %v3852_v7  ;;  %v2172_v53 = vcombine.low %v2164_v43, %v2171_v44  ;;  %v2467_v54 = vsel %vm4280_vm0, %v2179_v45, 0.0  ;;  %v1405_v55 = vmax.f32 %v1336_v27, 0.0  ;;  %v1340_v57 = vpop.f32.mrb[24].mxu0  ;;  %v3611_v26 = vpop.f32.mrb[13].mxu1  ;;  %vm4352_vm13 = vmand %vm1867_vm2, %vm1877_vm3 }
 0x126   : > { %vm1865_vm8 = vcmp.ge.s32.totalorder %v4121_v63, 0  ;;  %vm1875_vm9 = vcmp.lt.s32.totalorder %v4121_v63, 16  ;;  %v1366_v60 = vadd.f32 %v4059_v12, %v4176_v56  ;;  %2499 = vst.msk [vmem:[#allocation2 + $0x58] sm:$0x3] %vm2489_vm7, %v2467_v54  ;;  %v2181_v62 = vcombine.low %v1630_v37, %v1632_v46  ;;  %v3581_v6 = vpop.f32.mrb[25].mxu0  ;;  %vm4373_vm15 = vmand %vm4352_vm13, %vm1925_vm5 }
 0x127   : > { %v2188_v0 = vrot.slane %v2180_v49, %v3852_v7  ;;  %v1647_v1 = vrot.slane %v1633_v50, %v3852_v7  ;;  %v1648_v4 = vcombine.high %v1640_v51, %v1640_v51  ;;  %v2466_v56 = vsel %vm4245_vm14, %v2172_v53, 0.0  ;;  %vm4364_vm14 = vmand %vm1865_vm8, %vm1875_vm9 }
 0x128   : > { %v1428_v8 = vmin.f32 %v1405_v55, 6.0  ;;  %v1341_v10 = vadd.f32 %v4059_v12, %v1340_v57  ;;  %v1411_v2 = vmax.f32 %v1366_v60, 0.0  ;;  %2498 = vst.msk [vmem:[#allocation2 + $0x50] sm:$0xff] %vm2486_vm6, %v2466_v56  ;;  %v2195_v13 = vrot.slane %v2181_v62, %v3852_v7  ;;  %vm4388_vm3 = vmand %vm4364_vm14, %vm1890_vm4 }
 0x129   : > { %v1649_v48 = vcombine.high %v1647_v1, %v1647_v1  ;;  %v2197_v14 = vcombine.low %v1640_v51, %v1648_v4  ;;  %v1751_v58 = vcombine.high %v4272_v30, %v4272_v30  ;;  %v1345_v47 = vpop.f32.mrb[26].mxu0  ;;  %vm1868_vm0 = vcmp.ge.s32.totalorder %v4201_v16, 0 }
 0x12a   : > { %v1650_v17 = vcombine.high %v1428_v8, %v1428_v8  ;;  %v1657_v18 = vrot.slane %v1428_v8, %v3852_v7  ;;  %v1406_v19 = vmax.f32 %v1341_v10, 0.0  ;;  %v1434_v11 = vmin.f32 %v1411_v2, 6.0  ;;  %v3584_v34 = vpop.f32.mrb[27].mxu0 }
 0x12b   : > { %v2196_v28 = vcombine.low %v2188_v0, %v2195_v13  ;;  %v2198_v31 = vcombine.low %v1647_v1, %v1649_v48  ;;  %v2205_v29 = vrot.slane %v2197_v14, %v3852_v7  ;;  %v1346_v33 = vadd.f32 %v4059_v12, %v1345_v47 }
 0x12c   : > { %v1664_v25 = vrot.slane %v1650_v17, %v3852_v7  ;;  %v1665_v36 = vcombine.high %v1657_v18, %v1657_v18  ;;  %v2220_v37 = vrot.slane %v1657_v18, %v3852_v7  ;;  %v1429_v38 = vmin.f32 %v1406_v19, 6.0 }
 0x12d   : > { %v2212_v39 = vrot.slane %v2198_v31, %v3852_v7  ;;  %v2468_v27 = vsel %vm4328_vm11, %v2196_v28, 0.0  ;;  %v1752_v41 = vcombine.high %v1434_v11, %v1434_v11  ;;  %v1759_v42 = vrot.slane %v1434_v11, %v3852_v7  ;;  %v1350_v49 = vpop.f32.mrb[28].mxu0 }
 0x12e   : > { %v2221_v43 = vcombine.low %v1665_v36, %v1664_v25  ;;  %v2470_v44 = vsel %vm1940_vm12, %v2220_v37, 0.0  ;;  %2500 = vst.msk [vmem:[#allocation2 + $0x60] sm:$0xff] %vm2486_vm6, %v2468_v27  ;;  %v1666_v45 = vcombine.high %v1664_v25, %v1664_v25  ;;  %v1667_v46 = vcombine.high %v1429_v38, %v1429_v38  ;;  %v3587_v57 = vpop.f32.mrb[29].mxu0 }
 0x12f   : > { %v2213_v50 = vcombine.low %v2205_v29, %v2212_v39  ;;  %2502 = vst.msk [vmem:[#allocation2 + $0x70] sm:$0x3] %vm2489_vm7, %v2470_v44  ;;  %v1674_v51 = vrot.slane %v1429_v38, %v3852_v7  ;;  %v1766_v53 = vrot.slane %v1752_v41, %v3852_v7  ;;  %v1767_v54 = vcombine.high %v1759_v42, %v1759_v42 }
 0x130   : > { %v2229_v60 = vrot.slane %v2221_v43, %v3852_v7  ;;  %v1681_v61 = vrot.slane %v1667_v46, %v3852_v7  ;;  %v2320_v62 = vcombine.low %v1751_v58, %v1759_v42  ;;  %v1407_v0 = vmax.f32 %v1346_v33, 0.0 }
 0x131   : > { %v2469_v1 = vsel %vm4310_vm10, %v2213_v50, 0.0  ;;  %v1682_v4 = vcombine.high %v1674_v51, %v1674_v51  ;;  %v2222_v6 = vcombine.low %v1666_v45, %v1674_v51  ;;  %v1768_v56 = vcombine.high %v1766_v53, %v1766_v53  ;;  %v1355_v13 = vpop.f32.mrb[30].mxu0  ;;  %vm4409_vm10 = vmand %vm4364_vm14, %vm1925_vm5 }
 0x132   : > { %2501 = vst.msk [vmem:[#allocation2 + $0x68] sm:$0xff] %vm2486_vm6, %v2469_v1  ;;  %v2321_v8 = vcombine.low %v1767_v54, %v1766_v53  ;;  %v2328_v10 = vrot.slane %v2320_v62, %v3852_v7  ;;  %v1430_v63 = vmin.f32 %v1407_v0, 6.0  ;;  %v1683_v2 = vcombine.high %v1681_v61, %v1681_v61  ;;  %v3590_v18 = vpop.f32.mrb[31].mxu0 }
 0x133   : > { %v2236_v48 = vrot.slane %v2222_v6, %v3852_v7  ;;  %v2238_v14 = vcombine.low %v1682_v4, %v1681_v61  ;;  %v2343_v58 = vrot.slane %v1768_v56, %v3852_v7  ;;  %v1371_v17 = vadd.f32 %v4059_v12, %v4211_v32 }
 0x134   : > { %vm1878_vm2 = vcmp.lt.s32.totalorder %v4201_v16, 16  ;;  %v2335_v19 = vrot.slane %v2321_v8, %v3852_v7  ;;  %v1684_v11 = vcombine.high %v1430_v63, %v1430_v63  ;;  %v1691_v47 = vrot.slane %v1430_v63, %v3852_v7 }
 0x135   : > { %v1376_v32 = vadd.f32 %v4059_v12, %v4238_v59  ;;  %v2237_v26 = vcombine.low %v2229_v60, %v2236_v48  ;;  %v2246_v28 = vrot.slane %v2238_v14, %v3852_v7  ;;  %v2479_v31 = vsel %vm4373_vm15, %v2343_v58, 0.0  ;;  %vm4443_vm11 = vmand %vm1868_vm0, %vm1878_vm2 }
 0x136   : > { %v1412_v29 = vmax.f32 %v1371_v17, 0.0  ;;  %vm1866_vm8 = vcmp.ge.s32.totalorder %v4141_v24, 0  ;;  %vm1876_vm9 = vcmp.lt.s32.totalorder %v4141_v24, 16  ;;  %v2336_v33 = vcombine.low %v2328_v10, %v2335_v19  ;;  %2511 = vst.msk [vmem:[#allocation2 + $0xb8] sm:$0x3] %vm2489_vm7, %v2479_v31  ;;  %vm4474_vm15 = vmand %vm4443_vm11, %vm1925_vm5 }
 0x137   : > { %v1698_v34 = vrot.slane %v1684_v11, %v3852_v7  ;;  %v1699_v25 = vcombine.high %v1691_v47, %v1691_v47  ;;  %v2239_v36 = vcombine.low %v1683_v2, %v1691_v47  ;;  %v2471_v59 = vsel %vm4388_vm3, %v2237_v26, 0.0  ;;  %vm4454_vm12 = vmand %vm1866_vm8, %vm1876_vm9  ;;  %v4562_v26 = vld [vmem:[#allocation2 + $0x1a] sm:$0xff] }
 0x138   : > { %v1435_v38 = vmin.f32 %v1412_v29, 6.0  ;;  %v1413_v39 = vmax.f32 %v1376_v32, 0.0  ;;  %v1351_v27 = vadd.f32 %v4059_v12, %v1350_v49  ;;  %2503 = vst.msk [vmem:[#allocation2 + $0x78] sm:$0xff] %vm2486_vm6, %v2471_v59  ;;  %v2478_v41 = vsel %vm4352_vm13, %v2336_v33, 0.0  ;;  %vm4502_vm3 = vmand %vm4454_vm12, %vm1890_vm4 }
 0x139   : > { %v1700_v42 = vcombine.high %v1698_v34, %v1698_v34  ;;  %v2253_v43 = vrot.slane %v2239_v36, %v3852_v7  ;;  %v2261_v44 = vrot.slane %v1699_v25, %v3852_v7  ;;  %2510 = vst.msk [vmem:[#allocation2 + $0xb0] sm:$0xff] %vm2486_vm6, %v2478_v41  ;;  %v4425_v49 = vcombine.low %v1750_v35, %v4272_v30  ;;  %vm1946_vm8 = vmand %vm4454_vm12, %vm1925_vm5 }
 0x13a   : > { %v1769_v45 = vcombine.high %v1435_v38, %v1435_v38  ;;  %v1776_v46 = vrot.slane %v1435_v38, %v3852_v7  ;;  %v1436_v50 = vmin.f32 %v1413_v39, 6.0  ;;  %v1408_v51 = vmax.f32 %v1351_v27, 0.0  ;;  %vm4590_vm9 = vmand %vm4352_vm13, %vm1890_vm4 }
 0x13b   : > { %v2254_v53 = vcombine.low %v2246_v28, %v2253_v43  ;;  %v2473_v54 = vsel %vm4409_vm10, %v2261_v44, 0.0  ;;  %v1381_v57 = vadd.f32 %v4059_v12, %v4260_v20  ;;  %v2262_v1 = vcombine.low %v1698_v34, %v1700_v42  ;;  %v4491_v42 = vld [vmem:[%s5074_s3] ss:$0 sm:$0xff]  ;;  %v4496_v43 = vld [vmem:[%s5074_s3 + $0x1] ss:$0 sm:$0xff] }
 0x13c   : > { %2505 = vst.msk [vmem:[#allocation2 + $0x88] sm:$0x3] %vm2489_vm7, %v2473_v54  ;;  %v1783_v60 = vrot.slane %v1769_v45, %v3852_v7  ;;  %v1784_v61 = vcombine.high %v1776_v46, %v1776_v46  ;;  %v1786_v62 = vcombine.high %v1436_v50, %v1436_v50  ;;  %v1793_v0 = vrot.slane %v1436_v50, %v3852_v7 }
 0x13d   : > { %v2472_v30 = vsel %vm4364_vm14, %v2254_v53, 0.0  ;;  %v1431_v35 = vmin.f32 %v1408_v51, 6.0  ;;  %v1414_v4 = vmax.f32 %v1381_v57, 0.0  ;;  %v1356_v2 = vadd.f32 %v4059_v12, %v1355_v13  ;;  %vm4465_vm14 = vmand %vm4443_vm11, %vm1890_vm4  ;;  %v2527_v51 = vld [vmem:[#allocation2] sm:$0xff] }
 0x13e   : > { %2504 = vst.msk [vmem:[#allocation2 + $0x80] sm:$0xff] %vm2486_vm6, %v2472_v30  ;;  %v1785_v6 = vcombine.high %v1783_v60, %v1783_v60  ;;  %v2344_v56 = vcombine.low %v1776_v46, %v1784_v61  ;;  %v1800_v20 = vrot.slane %v1786_v62, %v3852_v7  ;;  %v1801_v40 = vcombine.high %v1793_v0, %v1793_v0  ;;  %v2579_v53 = vld [vmem:[#allocation2 + $0x1] sm:$0xff] }
 0x13f   : > { %v1701_v8 = vcombine.high %v1431_v35, %v1431_v35  ;;  %v1708_v10 = vrot.slane %v1431_v35, %v3852_v7  ;;  %v1437_v63 = vmin.f32 %v1414_v4, 6.0  ;;  %v1409_v24 = vmax.f32 %v1356_v2, 0.0  ;;  %v4520_v62 = vld [vmem:[%s5074_s3 + $0x2] ss:$0 sm:$0xff]  ;;  %v4530_v35 = vld [vmem:[%s5074_s3 + $0x3] ss:$0 sm:$0xff] }
 0x140   : > { %v2345_v48 = vcombine.low %v1783_v60, %v1785_v6  ;;  %v2352_v14 = vrot.slane %v2344_v56, %v3852_v7  ;;  %v1802_v58 = vcombine.high %v1800_v20, %v1800_v20  ;;  %v2361_v17 = vcombine.low %v1793_v0, %v1801_v40  ;;  %v2631_v4 = vld [vmem:[#allocation2 + $0x2] sm:$0xff]  ;;  %v4532_v6 = vld [vmem:[#allocation2 + $0x18] sm:$0xff] }
 0x141   : > { %v1715_v18 = vrot.slane %v1701_v8, %v3852_v7  ;;  %v1716_v3 = vcombine.high %v1708_v10, %v1708_v10  ;;  %v1803_v19 = vcombine.high %v1437_v63, %v1437_v63  ;;  %v1810_v11 = vrot.slane %v1437_v63, %v3852_v7 }
 0x142   : > { %v2359_v13 = vrot.slane %v2345_v48, %v3852_v7  ;;  %v2362_v47 = vcombine.low %v1800_v20, %v1802_v58  ;;  %v2369_v32 = vrot.slane %v2361_v17, %v3852_v7  ;;  %v2270_v28 = vrot.slane %v2262_v1, %v3852_v7  ;;  %v4548_v48 = vld [vmem:[%s5074_s3 + $0x4] ss:$0 sm:$0xff] }
 0x143   : > { %v1717_v31 = vcombine.high %v1715_v18, %v1715_v18  ;;  %v2263_v29 = vcombine.low %v1708_v10, %v1716_v3  ;;  %v1818_v33 = vcombine.high %v1810_v11, %v1810_v11  ;;  %v2384_v59 = vrot.slane %v1810_v11, %v3852_v7 }
 0x144   : > { %v2360_v25 = vcombine.low %v2352_v14, %v2359_v13  ;;  %v2376_v36 = vrot.slane %v2362_v47, %v3852_v7  ;;  %v1432_v37 = vmin.f32 %v1409_v24, 6.0  ;;  %v1817_v27 = vrot.slane %v1803_v19, %v3852_v7  ;;  %v4550_v14 = vld [vmem:[#allocation2 + $0x19] sm:$0xff] }
 0x145   : > { %v2277_v38 = vrot.slane %v2263_v29, %v3852_v7  ;;  %v4481_v39 = vcombine.low %v1715_v18, %v1717_v31  ;;  %v1386_v41 = vadd.f32 %v4059_v12, %v4295_v52  ;;  %vm1869_vm0 = vcmp.ge.s32.totalorder %v4206_v22, 0 }
 0x146   : > { %vm1879_vm2 = vcmp.lt.s32.totalorder %v4206_v22, 16  ;;  %v2377_v44 = vcombine.low %v2369_v32, %v2376_v36  ;;  %v2480_v45 = vsel %vm4465_vm14, %v2360_v25, 0.0  ;;  %v2482_v46 = vsel %vm4474_vm15, %v2384_v59, 0.0  ;;  %v4560_v32 = vld [vmem:[%s5074_s3 + $0x5] ss:$0 sm:$0xff] }
 0x147   : > { %v1718_v50 = vcombine.high %v1432_v37, %v1432_v37  ;;  %v2318_v54 = vrot.slane %v4425_v49, %v3852_v7  ;;  %v2278_v57 = vcombine.low %v2270_v28, %v2277_v38  ;;  %v4512_v60 = vcombine.low %v1818_v33, %v1817_v27  ;;  %2512 = vst.msk [vmem:[#allocation2 + $0xc0] sm:$0xff] %vm2486_vm6, %v2480_v45  ;;  %v2528_v33 = vld [vmem:[#allocation2 + $0x8] sm:$0xff]  ;;  %v4584_v38 = vld [vmem:[#allocation2 + $0x30] sm:$0xff]  ;;  %vm4607_vm13 = vmand %vm1869_vm0, %vm1879_vm2 }
 0x148   : > { %2514 = vst.msk [vmem:[#allocation2 + $0xd0] sm:$0x3] %vm2489_vm7, %v2482_v46  ;;  %v1725_v61 = vrot.slane %v1432_v37, %v3852_v7  ;;  %v2287_v0 = vrot.slane %v4481_v39, %v3852_v7  ;;  %v2481_v49 = vsel %vm4443_vm11, %v2377_v44, 0.0  ;;  %v1415_v30 = vmax.f32 %v1386_v41, 0.0  ;;  %v4582_v37 = vld [vmem:[%s5074_s3 + $0x7] ss:$0 sm:$0xff]  ;;  %vm4622_vm10 = vmand %vm4607_vm13, %vm1890_vm4 }
 0x149   : > { %v1732_v1 = vrot.slane %v1718_v50, %v3852_v7  ;;  %v2474_v56 = vsel %vm4502_vm3, %v2278_v57, 0.0  ;;  %2513 = vst.msk [vmem:[#allocation2 + $0xc8] sm:$0xff] %vm2486_vm6, %v2481_v49  ;;  %v2547_v40 = vmul.f32 %v4491_v42, %v2527_v51  ;;  %v2599_v8 = vmul.f32 %v4496_v43, %v2579_v53  ;;  %v2580_v39 = vld [vmem:[#allocation2 + $0x9] sm:$0xff]  ;;  %v4597_v44 = vld [vmem:[%s5074_s3 + $0x8] ss:$0 sm:$0xff]  ;;  %v4601_v46 = vld [vmem:[#allocation2 + $0x31] sm:$0xff] }
 0x14a   : > { %v1733_v20 = vcombine.high %v1725_v61, %v1725_v61  ;;  %2506 = vst.msk [vmem:[#allocation2 + $0x90] sm:$0xff] %vm2486_vm6, %v2474_v56  ;;  %v1438_v23 = vmin.f32 %v1415_v30, 6.0  ;;  %v1819_v2 = vcombine.high %v1817_v27, %v1817_v27  ;;  %v2651_v18 = vmul.f32 %v4520_v62, %v2631_v4  ;;  %v2737_v4 = vld [vmem:[#allocation2 + $0x21] sm:$0xff]  ;;  %vm4698_vm4 = vmand %vm4607_vm13, %vm1925_vm5 }
 0x14b   : > { %v1734_v10 = vcombine.high %v1732_v1, %v1732_v1  ;;  %v2302_v63 = vrot.slane %v1732_v1, %v3852_v7  ;;  %v2615_v17 = vadd.f32 %v2599_v8, %v2547_v40  ;;  %v2704_v3 = vmul.f32 %v4530_v35, %v4532_v6  ;;  %v4628_v1 = vld [vmem:[#allocation2 + $0x32] sm:$0xff] }
 0x14c   : > { %v2280_v58 = vcombine.low %v1725_v61, %v1733_v20  ;;  %v1820_v13 = vcombine.high %v1438_v23, %v1438_v23  ;;  %v1827_v47 = vrot.slane %v1438_v23, %v3852_v7  ;;  %v2393_v24 = vrot.slane %v4512_v60, %v3852_v7  ;;  %v2632_v60 = vld [vmem:[#allocation2 + $0xa] sm:$0xff]  ;;  %v2685_v61 = vld [vmem:[#allocation2 + $0x20] sm:$0xff]  ;;  %v4639_v23 = vld [vmem:[#allocation2 + $0x38] sm:$0xff] }
 0x14d   : > { %v2303_v19 = vcombine.low %v1734_v10, %v4251_v9  ;;  %v2476_v11 = vsel %vm1946_vm8, %v2302_v63, 0.0  ;;  %v4571_v9 = vld [vmem:[%s5074_s3 + $0x6] ss:$0 sm:$0xff]  ;;  %v2667_v31 = vadd.f32 %v2651_v18, %v2615_v17  ;;  %v2756_v29 = vmul.f32 %v4548_v48, %v4550_v14 }
 0x14e   : > { %v2294_v28 = vrot.slane %v2280_v58, %v3852_v7  ;;  %2508 = vst.msk [vmem:[#allocation2 + $0xa0] sm:$0x3] %vm2489_vm7, %v2476_v11  ;;  %v4577_v25 = vrot.slane %v1820_v13, %v3852_v7  ;;  %v1835_v36 = vcombine.high %v1827_v47, %v1827_v47  ;;  %v2386_v59 = vcombine.low %v1819_v2, %v1827_v47  ;;  %v2789_v20 = vld [vmem:[#allocation2 + $0x22] sm:$0xff]  ;;  %v4641_v2 = vld [vmem:[#allocation2 + $0x39] sm:$0xff] }
 0x14f   : > { %v2311_v34 = vrot.slane %v2303_v19, %v3852_v7  ;;  %v2720_v52 = vadd.f32 %v2704_v3, %v2667_v31  ;;  %v2808_v45 = vmul.f32 %v4560_v32, %v4562_v26  ;;  %v2548_v57 = vmul.f32 %v4491_v42, %v2528_v33  ;;  %v4650_v19 = vld [vmem:[#allocation2 + $0x3a] sm:$0xff] }
 0x150   : > { %v2295_v41 = vcombine.low %v2287_v0, %v2294_v28  ;;  %v2400_v51 = vrot.slane %v2386_v59, %v3852_v7  ;;  %v4613_v53 = vcombine.low %v1835_v36, %v4577_v25  ;;  %v2861_v49 = vmul.f32 %v4571_v9, %v4584_v38 }
 0x151   : > { %v2319_v50 = vcombine.low %v2311_v34, %v2318_v54  ;;  %v2772_v0 = vadd.f32 %v2756_v29, %v2720_v52  ;;  %v2600_v30 = vmul.f32 %v4496_v43, %v2580_v39  ;;  %v2913_v56 = vmul.f32 %v4582_v37, %v4601_v46 }
 0x152   : > { %v2475_v54 = vsel %vm4454_vm12, %v2295_v41, 0.0  ;;  %v2401_v5 = vcombine.low %v2393_v24, %v2400_v51  ;;  %v2652_v10 = vmul.f32 %v4520_v62, %v2632_v60  ;;  %v2705_v63 = vmul.f32 %v4530_v35, %v2685_v61  ;;  %v4677_v41 = vld [vmem:[#allocation2 + $0x48] sm:$0xff] }
 0x153   : > { %v2477_v16 = vsel %vm4590_vm9, %v2319_v50, 0.0  ;;  %2507 = vst.msk [vmem:[#allocation2 + $0x98] sm:$0xff] %vm2486_vm6, %v2475_v54  ;;  %v2824_v40 = vadd.f32 %v2808_v45, %v2772_v0  ;;  %v2616_v8 = vadd.f32 %v2600_v30, %v2548_v57  ;;  %v2410_v58 = vrot.slane %v4613_v53, %v3852_v7 }
 0x154   : > { %2509 = vst.msk [vmem:[#allocation2 + $0xa8] sm:$0xff] %vm2486_vm6, %v2477_v16  ;;  %v2483_v17 = vsel %vm4622_vm10, %v2401_v5, 0.0  ;;  %v2965_v18 = vmul.f32 %v4597_v44, %v4628_v1  ;;  %v2757_v3 = vmul.f32 %v4548_v48, %v2737_v4  ;;  %v2809_v47 = vmul.f32 %v4560_v32, %v2789_v20 }
 0x155   : > { %2515 = vst.msk [vmem:[#allocation2 + $0xd8] sm:$0xff] %vm2486_vm6, %v2483_v17  ;;  %v2877_v11 = vadd.f32 %v2861_v49, %v2824_v40  ;;  %v2668_v13 = vadd.f32 %v2652_v10, %v2616_v8  ;;  %v1391_v24 = vadd.f32 %v4059_v12, %v4321_v15  ;;  %v2862_v28 = vmul.f32 %v4571_v9, %v4639_v23  ;;  %v4669_v12 = vld [vmem:[%s5075_s4] ss:$0 sm:$0xff]  ;;  %v4689_v49 = vld [vmem:[#allocation2 + $0x49] sm:$0xff] }
 0x156   : > { %v2914_v31 = vmul.f32 %v4582_v37, %v4641_v2  ;;  %v2549_v29 = vmul.f32 %v4491_v42, %v4532_v6  ;;  %v2601_v33 = vmul.f32 %v4496_v43, %v4550_v14  ;;  %v2966_v59 = vmul.f32 %v4597_v44, %v4650_v19 }
 0x157   : > { %v2929_v34 = vadd.f32 %v2913_v56, %v2877_v11  ;;  %v2721_v36 = vadd.f32 %v2705_v63, %v2668_v13  ;;  %v1416_v39 = vmax.f32 %v1391_v24, 0.0  ;;  %v1836_v15 = vcombine.high %v4577_v25, %v4577_v25 }
 0x158   : > { %v2617_v27 = vadd.f32 %v2601_v33, %v2549_v29  ;;  %v2653_v6 = vmul.f32 %v4520_v62, %v4562_v26  ;;  %v2706_v14 = vmul.f32 %v4530_v35, %v4584_v38  ;;  %v2758_v51 = vmul.f32 %v4548_v48, %v4601_v46 }
 0x159   : > { %v2981_v52 = vadd.f32 %v2965_v18, %v2929_v34  ;;  %v2773_v45 = vadd.f32 %v2757_v3, %v2721_v36  ;;  %v1439_v50 = vmin.f32 %v1416_v39, 6.0  ;;  %v2810_v57 = vmul.f32 %v4560_v32, %v4628_v1  ;;  %v2947_v39 = vld [vmem:[#allocation2 + $0x4a] sm:$0xff] }
 0x15a   : > { %v2669_v53 = vadd.f32 %v2653_v6, %v2617_v27  ;;  %v2550_v25 = vmul.f32 %v4491_v42, %v2685_v61  ;;  %v2602_v60 = vmul.f32 %v4496_v43, %v2737_v4  ;;  %v2863_v0 = vmul.f32 %v4571_v9, %v4677_v41 }
 0x15b   : > { %v3004_v26 = vadd.f32 %v4669_v12, %v2981_v52  ;;  %v2825_v54 = vadd.f32 %v2809_v47, %v2773_v45  ;;  %v1843_v22 = vrot.slane %v1439_v50, %v3852_v7  ;;  %v2654_v5 = vmul.f32 %v4520_v62, %v2789_v20  ;;  %v4708_v47 = vld [vmem:[#allocation2 + $0x50] sm:$0xff] }
 0x15c   : > { %v2722_v30 = vadd.f32 %v2706_v14, %v2669_v53  ;;  %v2618_v16 = vadd.f32 %v2602_v60, %v2550_v25  ;;  %v2707_v56 = vmul.f32 %v4530_v35, %v4639_v23  ;;  %v2915_v17 = vmul.f32 %v4582_v37, %v4689_v49  ;;  %v4722_v14 = vld [vmem:[#allocation2 + $0x51] sm:$0xff] }
 0x15d   : > { %v3020_v61 = vmax.f32 %v3004_v26, 0.0  ;;  %v2878_v40 = vadd.f32 %v2862_v28, %v2825_v54  ;;  %v1844_v4 = vcombine.high %v1843_v22, %v1843_v22  ;;  %v2403_v8 = vcombine.low %v1836_v15, %v1843_v22  ;;  %v4733_v53 = vld [vmem:[#allocation2 + $0x52] sm:$0xff]  ;;  %v4739_v54 = vld [vmem:[#allocation2 + $0x60] sm:$0xff] }
 0x15e   : > { %v2774_v63 = vadd.f32 %v2758_v51, %v2722_v30  ;;  %v2670_v20 = vadd.f32 %v2654_v5, %v2618_v16  ;;  %v2759_v18 = vmul.f32 %v4548_v48, %v4641_v2  ;;  %v2811_v29 = vmul.f32 %v4560_v32, %v4650_v19  ;;  %v4741_v22 = vld [vmem:[#allocation2 + $0x61] sm:$0xff] }
 0x15f   : > { %v3036_v3 = vmin.f32 %v3020_v61, 6.0  ;;  %v2930_v11 = vadd.f32 %v2914_v31, %v2878_v40  ;;  %v2417_v13 = vrot.slane %v2403_v8, %v3852_v7  ;;  %v2425_v21 = vrot.slane %v1844_v4, %v3852_v7  ;;  %v4749_v61 = vld [vmem:[#allocation2 + $0x62] sm:$0xff] }
 0x160   : > { %v2826_v24 = vadd.f32 %v2810_v57, %v2774_v63  ;;  %v2723_v28 = vadd.f32 %v2707_v56, %v2670_v20  ;;  %v2551_v33 = vmul.f32 %v4491_v42, %v4584_v38  ;;  %v2603_v7 = vmul.f32 %v4496_v43, %v4601_v46 }
 0x161   : > { %3620 = vmatprep.mubr.msk.f32.mxu1 %vm2486_vm6, %v3036_v3  ;;  %v2982_v34 = vadd.f32 %v2966_v59, %v2930_v11  ;;  %v2418_v36 = vcombine.low %v2410_v58, %v2417_v13  ;;  %v2485_v31 = vsel %vm4698_vm4, %v2425_v21, 0.0  ;;  %v2864_v6 = vmul.f32 %v4571_v9, %v4708_v47 }
 0x162   : > { %2517 = vst.msk [vmem:[#allocation2 + $0xe8] sm:$0x3] %vm2489_vm7, %v2485_v31  ;;  %v2879_v15 = vadd.f32 %v2863_v0, %v2826_v24  ;;  %v2775_v27 = vadd.f32 %v2759_v18, %v2723_v28  ;;  %v2655_v38 = vmul.f32 %v4520_v62, %v4628_v1  ;;  %v2619_v52 = vadd.f32 %v2603_v7, %v2551_v33  ;;  %v4766_v24 = vld [vmem:[#allocation2 + $0x68] sm:$0xff] }
 0x163   : > { %v3005_v58 = vadd.f32 %v4669_v12, %v2982_v34  ;;  %v2484_v59 = vsel %vm4607_vm13, %v2418_v36, 0.0  ;;  %v2708_v46 = vmul.f32 %v4530_v35, %v4677_v41  ;;  %v2967_v50 = vmul.f32 %v4597_v44, %v2947_v39  ;;  %v4768_v28 = vld [vmem:[#allocation2 + $0x69] sm:$0xff] }
 0x164   : > { %2516 = vst.msk [vmem:[#allocation2 + $0xe0] sm:$0xff] %vm2486_vm6, %v2484_v59  ;;  %v2931_v45 = vadd.f32 %v2915_v17, %v2879_v15  ;;  %v2827_v51 = vadd.f32 %v2811_v29, %v2775_v27  ;;  %v2916_v1 = vmul.f32 %v4582_v37, %v4722_v14  ;;  %v2671_v25 = vadd.f32 %v2655_v38, %v2619_v52  ;;  %v4777_v27 = vld [vmem:[#allocation2 + $0x6a] sm:$0xff] }
 0x165   : > { %v3021_v57 = vmax.f32 %v3005_v58, 0.0  ;;  %v2760_v55 = vmul.f32 %v4548_v48, %v4689_v49  ;;  %v2552_v0 = vmul.f32 %v4491_v42, %v4639_v23  ;;  %v2604_v30 = vmul.f32 %v4496_v43, %v4641_v2 }
 0x166   : > { %v2983_v60 = vadd.f32 %v2967_v50, %v2931_v45  ;;  %v2880_v26 = vadd.f32 %v2864_v6, %v2827_v51  ;;  %v2968_v5 = vmul.f32 %v4597_v44, %v4733_v53  ;;  %v2724_v56 = vadd.f32 %v2708_v46, %v2671_v25  ;;  %v4787_v46 = vld [vmem:[#allocation2 + $0x78] sm:$0xff] }
 0x167   : > { %v3037_v16 = vmin.f32 %v3021_v57, 6.0  ;;  %v2656_v40 = vmul.f32 %v4520_v62, %v4650_v19  ;;  %v2620_v10 = vadd.f32 %v2604_v30, %v2552_v0  ;;  %v2709_v23 = vmul.f32 %v4530_v35, %v4708_v47 }
 0x168   : > { %v3006_v4 = vadd.f32 %v4669_v12, %v2983_v60  ;;  %v2932_v8 = vadd.f32 %v2916_v1, %v2880_v26  ;;  %v2776_v2 = vadd.f32 %v2760_v55, %v2724_v56  ;;  %v2812_v63 = vmul.f32 %v4560_v32, %v2947_v39  ;;  %v4795_v55 = vld [vmem:[#allocation2 + $0x79] sm:$0xff] }
 0x169   : > { %3621 = vmatmul.mubr.msk.f32.vlgmr.msra.gmra.mrb[14].mxu1 %vm2486_vm6, %v3037_v16  ;;  %v2865_v17 = vmul.f32 %v4571_v9, %v4739_v54  ;;  %v2917_v20 = vmul.f32 %v4582_v37, %v4741_v22  ;;  %v2969_v3 = vmul.f32 %v4597_v44, %v4749_v61  ;;  %v2672_v11 = vadd.f32 %v2656_v40, %v2620_v10  ;;  %v4797_v60 = vld [vmem:[#allocation2 + $0x7a] sm:$0xff] }
 0x16a   : > { %v3022_v18 = vmax.f32 %v3006_v4, 0.0  ;;  %v2984_v19 = vadd.f32 %v2968_v5, %v2932_v8  ;;  %v2828_v13 = vadd.f32 %v2812_v63, %v2776_v2  ;;  %v2761_v21 = vmul.f32 %v4548_v48, %v4722_v14 }
 0x16b   : > { %v2553_v29 = vmul.f32 %v4491_v42, %v4677_v41  ;;  %v2605_v33 = vmul.f32 %v4496_v43, %v4689_v49  ;;  %v2725_v31 = vadd.f32 %v2709_v23, %v2672_v11  ;;  %v2813_v7 = vmul.f32 %v4560_v32, %v4733_v53 }
 0x16c   : > { %v3038_v34 = vmin.f32 %v3022_v18, 6.0  ;;  %v3007_v36 = vadd.f32 %v4669_v12, %v2984_v19  ;;  %v2881_v15 = vadd.f32 %v2865_v17, %v2828_v13  ;;  %v2657_v38 = vmul.f32 %v4520_v62, %v2947_v39  ;;  %v4815_v17 = vld [vmem:[#allocation2 + $0x80] sm:$0xff] }
 0x16d   : > { %v2621_v6 = vadd.f32 %v2605_v33, %v2553_v29  ;;  %v2710_v58 = vmul.f32 %v4530_v35, %v4739_v54  ;;  %v2777_v49 = vadd.f32 %v2761_v21, %v2725_v31  ;;  %v2866_v59 = vmul.f32 %v4571_v9, %v4766_v24  ;;  %v4825_v29 = vld [vmem:[#allocation2 + $0x81] sm:$0xff] }
 0x16e   : > { %3623 = vmatprep.mubr.msk.f32.mxu1 %vm2486_vm6, %v3038_v34  ;;  %v3023_v41 = vmax.f32 %v3007_v36, 0.0  ;;  %v2918_v52 = vmul.f32 %v4582_v37, %v4768_v28  ;;  %v2933_v45 = vadd.f32 %v2917_v20, %v2881_v15  ;;  %v2762_v39 = vmul.f32 %v4548_v48, %v4741_v22 }
 0x16f   : > { %v2673_v50 = vadd.f32 %v2657_v38, %v2621_v6  ;;  %v2554_v51 = vmul.f32 %v4491_v42, %v4708_v47  ;;  %v2829_v1 = vadd.f32 %v2813_v7, %v2777_v49  ;;  %v2970_v25 = vmul.f32 %v4597_v44, %v4777_v27 }
 0x170   : > { %v3039_v57 = vmin.f32 %v3023_v41, 6.0  ;;  %v2606_v26 = vmul.f32 %v4496_v43, %v4722_v14  ;;  %v2985_v0 = vadd.f32 %v2969_v3, %v2933_v45  ;;  %v2814_v16 = vmul.f32 %v4560_v32, %v4749_v61  ;;  %v4839_v41 = vld [vmem:[#allocation2 + $0x90] sm:$0xff] }
 0x171   : > { %v2726_v30 = vadd.f32 %v2710_v58, %v2673_v50  ;;  %v2867_v47 = vmul.f32 %v4571_v9, %v4787_v46  ;;  %v2882_v5 = vadd.f32 %v2866_v59, %v2829_v1  ;;  %v2658_v40 = vmul.f32 %v4520_v62, %v4733_v53  ;;  %v2952_v50 = vld [vmem:[#allocation2 + $0x82] sm:$0xff] }
 0x172   : > { %3624 = vmatmul.mubr.msk.f32.gmra.mrb[16].mxu1 %vm2486_vm6, %v3039_v57  ;;  %v2622_v56 = vadd.f32 %v2606_v26, %v2554_v51  ;;  %v2711_v4 = vmul.f32 %v4530_v35, %v4766_v24  ;;  %v3008_v14 = vadd.f32 %v4669_v12, %v2985_v0  ;;  %v2919_v10 = vmul.f32 %v4582_v37, %v4795_v55  ;;  %v4847_v57 = vld [vmem:[#allocation2 + $0x91] sm:$0xff] }
 0x173   : > { %v2778_v8 = vadd.f32 %v2762_v39, %v2726_v30  ;;  %v2971_v23 = vmul.f32 %v4597_v44, %v4797_v60  ;;  %v2934_v2 = vadd.f32 %v2918_v52, %v2882_v5  ;;  %v2555_v20 = vmul.f32 %v4491_v42, %v4739_v54 }
 0x174   : > { %v2674_v63 = vadd.f32 %v2658_v40, %v2622_v56  ;;  %v2607_v53 = vmul.f32 %v4496_v43, %v4741_v22  ;;  %v3024_v18 = vmax.f32 %v3008_v14, 0.0  ;;  %v2763_v3 = vmul.f32 %v4548_v48, %v4768_v28 }
 0x175   : > { %v2830_v19 = vadd.f32 %v2814_v16, %v2778_v8  ;;  %v2659_v11 = vmul.f32 %v4520_v62, %v4749_v61  ;;  %v2986_v13 = vadd.f32 %v2970_v25, %v2934_v2  ;;  %v2712_v34 = vmul.f32 %v4530_v35, %v4787_v46  ;;  %v2953_v2 = vld [vmem:[#allocation2 + $0x92] sm:$0xff] }
 0x176   : > { %v2727_v21 = vadd.f32 %v2711_v4, %v2674_v63  ;;  %v2623_v33 = vadd.f32 %v2607_v53, %v2555_v20  ;;  %v3040_v54 = vmin.f32 %v3024_v18, 6.0  ;;  %v2815_v22 = vmul.f32 %v4560_v32, %v4777_v27  ;;  %v4859_v4 = vld [vmem:[#allocation2 + $0x98] sm:$0xff] }
 0x177   : > { %v2883_v36 = vadd.f32 %v2867_v47, %v2830_v19  ;;  %v2868_v31 = vmul.f32 %v4571_v9, %v4815_v17  ;;  %v3009_v7 = vadd.f32 %v4669_v12, %v2986_v13  ;;  %v2764_v6 = vmul.f32 %v4548_v48, %v4795_v55 }
 0x178   : > { %v2779_v15 = vadd.f32 %v2763_v3, %v2727_v21  ;;  %v2675_v61 = vadd.f32 %v2659_v11, %v2623_v33  ;;  %3626 = vmatprep.mubr.msk.f32.mxu1 %vm2486_vm6, %v3040_v54  ;;  %v2920_v58 = vmul.f32 %v4582_v37, %v4825_v29  ;;  %v2556_v49 = vmul.f32 %v4491_v42, %v4766_v24  ;;  %v4873_v33 = vld [vmem:[#allocation2 + $0x99] sm:$0xff] }
 0x179   : > { %v2935_v38 = vadd.f32 %v2919_v10, %v2883_v36  ;;  %v2608_v59 = vmul.f32 %v4496_v43, %v4768_v28  ;;  %v3025_v52 = vmax.f32 %v3009_v7, 0.0  ;;  %v2816_v51 = vmul.f32 %v4560_v32, %v4797_v60 }
 0x17a   : > { %v2831_v45 = vadd.f32 %v2815_v22, %v2779_v15  ;;  %v2728_v39 = vadd.f32 %v2712_v34, %v2675_v61  ;;  %v2660_v26 = vmul.f32 %v4520_v62, %v4777_v27  ;;  %v2713_v24 = vmul.f32 %v4530_v35, %v4815_v17  ;;  %v4879_v22 = vld [vmem:[#allocation2 + $0x9a] sm:$0xff] }
 0x17b   : > { %v2987_v1 = vadd.f32 %v2971_v23, %v2935_v38  ;;  %v2624_v25 = vadd.f32 %v2608_v59, %v2556_v49  ;;  %v3041_v0 = vmin.f32 %v3025_v52, 6.0  ;;  %v2869_v16 = vmul.f32 %v4571_v9, %v4839_v41 }
 0x17c   : > { %v2884_v30 = vadd.f32 %v2868_v31, %v2831_v45  ;;  %v2780_v28 = vadd.f32 %v2764_v6, %v2728_v39  ;;  %v2972_v5 = vmul.f32 %v4597_v44, %v2952_v50  ;;  %v2921_v56 = vmul.f32 %v4582_v37, %v4847_v57  ;;  %v4894_v39 = vld [vmem:[#allocation2 + $0xa9] sm:$0xff] }
 0x17d   : > { %v3010_v47 = vadd.f32 %v4669_v12, %v2987_v1  ;;  %v2676_v40 = vadd.f32 %v2660_v26, %v2624_v25  ;;  %3627 = vmatmul.mubr.msk.f32.gmra.mrb[18].mxu1 %vm2486_vm6, %v3041_v0  ;;  %v2765_v8 = vmul.f32 %v4548_v48, %v4825_v29  ;;  %v2817_v10 = vmul.f32 %v4560_v32, %v2952_v50 }
 0x17e   : > { %v2936_v27 = vadd.f32 %v2920_v58, %v2884_v30  ;;  %v2832_v14 = vadd.f32 %v2816_v51, %v2780_v28  ;;  %v2557_v20 = vmul.f32 %v4491_v42, %v4787_v46  ;;  %v2609_v53 = vmul.f32 %v4496_v43, %v4795_v55  ;;  %v4888_v58 = vld [vmem:[#allocation2 + $0xa8] sm:$0xff] }
 0x17f   : > { %v3026_v23 = vmax.f32 %v3010_v47, 0.0  ;;  %v2729_v63 = vadd.f32 %v2713_v24, %v2676_v40  ;;  %v2870_v3 = vmul.f32 %v4571_v9, %v4859_v4  ;;  %v2661_v11 = vmul.f32 %v4520_v62, %v4797_v60  ;;  %v4896_v51 = vld [vmem:[#allocation2 + $0xaa] sm:$0xff] }
 0x180   : > { %v2988_v18 = vadd.f32 %v2972_v5, %v2936_v27  ;;  %v2885_v19 = vadd.f32 %v2869_v16, %v2832_v14  ;;  %v2625_v34 = vadd.f32 %v2609_v53, %v2557_v20  ;;  %v2714_v54 = vmul.f32 %v4530_v35, %v4839_v41 }
 0x181   : > { %v3042_v13 = vmin.f32 %v3026_v23, 6.0  ;;  %v2781_v21 = vadd.f32 %v2765_v8, %v2729_v63  ;;  %v2973_v55 = vmul.f32 %v4597_v44, %v2953_v2  ;;  %v2766_v60 = vmul.f32 %v4548_v48, %v4847_v57 }
 0x182   : > { %v3011_v46 = vadd.f32 %v4669_v12, %v2988_v18  ;;  %v2937_v36 = vadd.f32 %v2921_v56, %v2885_v19  ;;  %v2677_v7 = vadd.f32 %v2661_v11, %v2625_v34  ;;  %v2558_v15 = vmul.f32 %v4491_v42, %v4815_v17  ;;  %v2852_v18 = vld [vmem:[#allocation2 + $0xb0] sm:$0xff] }
 0x183   : > { %3629 = vmatprep.mubr.msk.f32.mxu1 %vm2486_vm6, %v3042_v13  ;;  %v2833_v31 = vadd.f32 %v2817_v10, %v2781_v21  ;;  %v2922_v38 = vmul.f32 %v4582_v37, %v4873_v33  ;;  %v2610_v49 = vmul.f32 %v4496_v43, %v4825_v29  ;;  %v2974_v52 = vmul.f32 %v4597_v44, %v4879_v22  ;;  %v2904_v19 = vld [vmem:[#allocation2 + $0xb1] sm:$0xff] }
 0x184   : > { %v3027_v61 = vmax.f32 %v3011_v46, 0.0  ;;  %v2989_v6 = vadd.f32 %v2973_v55, %v2937_v36  ;;  %v2730_v45 = vadd.f32 %v2714_v54, %v2677_v7  ;;  %v2662_v17 = vmul.f32 %v4520_v62, %v2952_v50  ;;  %v2853_v55 = vld [vmem:[#allocation2 + $0xc0] sm:$0xff] }
 0x185   : > { %v2886_v59 = vadd.f32 %v2870_v3, %v2833_v31  ;;  %v2626_v26 = vadd.f32 %v2610_v49, %v2558_v15  ;;  %v2715_v24 = vmul.f32 %v4530_v35, %v4859_v4  ;;  %v2818_v30 = vmul.f32 %v4560_v32, %v2953_v2  ;;  %v2956_v3 = vld [vmem:[#allocation2 + $0xb2] sm:$0xff]  ;;  %v2905_v15 = vld [vmem:[#allocation2 + $0xc1] sm:$0xff] }
 0x186   : > { %v3043_v1 = vmin.f32 %v3027_v61, 6.0  ;;  %v3012_v25 = vadd.f32 %v4669_v12, %v2989_v6  ;;  %v2782_v29 = vadd.f32 %v2766_v60, %v2730_v45  ;;  %v2871_v28 = vmul.f32 %v4571_v9, %v4888_v58 }
 0x187   : > { %v2938_v0 = vadd.f32 %v2922_v38, %v2886_v59  ;;  %v2923_v50 = vmul.f32 %v4582_v37, %v4894_v39  ;;  %v2975_v47 = vmul.f32 %v4597_v44, %v4896_v51  ;;  %v2678_v5 = vadd.f32 %v2662_v17, %v2626_v26 }
 0x188   : > { %3630 = vmatmul.mubr.msk.f32.gmra.mrb[20].mxu1 %vm2486_vm6, %v3043_v1  ;;  %v3028_v16 = vmax.f32 %v3012_v25, 0.0  ;;  %v2834_v40 = vadd.f32 %v2818_v30, %v2782_v29  ;;  %v2559_v27 = vmul.f32 %v4491_v42, %v4839_v41  ;;  %v2611_v14 = vmul.f32 %v4496_v43, %v4847_v57 }
 0x189   : > { %v2990_v56 = vadd.f32 %v2974_v52, %v2938_v0  ;;  %v2731_v10 = vadd.f32 %v2715_v24, %v2678_v5  ;;  %v2767_v23 = vmul.f32 %v4548_v48, %v4873_v33  ;;  %v2819_v63 = vmul.f32 %v4560_v32, %v4879_v22 }
 0x18a   : > { %v3044_v8 = vmin.f32 %v3028_v16, 6.0  ;;  %v2887_v53 = vadd.f32 %v2871_v28, %v2834_v40  ;;  %v2627_v11 = vadd.f32 %v2611_v14, %v2559_v27  ;;  %v2663_v41 = vmul.f32 %v4520_v62, %v2953_v2  ;;  %v2854_v40 = vld [vmem:[#allocation2 + $0xc8] sm:$0xff] }
 0x18b   : > { %v3013_v20 = vadd.f32 %v4669_v12, %v2990_v56  ;;  %v2783_v57 = vadd.f32 %v2767_v23, %v2731_v10  ;;  %v2872_v13 = vmul.f32 %v4571_v9, %v2852_v18  ;;  %v2924_v21 = vmul.f32 %v4582_v37, %v2904_v19 }
 0x18c   : > { %3632 = vmatprep.mubr.msk.f32.mxu1 %vm2486_vm6, %v3044_v8  ;;  %v2716_v34 = vmul.f32 %v4530_v35, %v4888_v58  ;;  %v2939_v46 = vadd.f32 %v2923_v50, %v2887_v53  ;;  %v2679_v36 = vadd.f32 %v2663_v41, %v2627_v11  ;;  %v2560_v31 = vmul.f32 %v4491_v42, %v4859_v4  ;;  %v2957_v4 = vld [vmem:[#allocation2 + $0xc2] sm:$0xff] }
 0x18d   : > { %v3029_v54 = vmax.f32 %v3013_v20, 0.0  ;;  %v2835_v7 = vadd.f32 %v2819_v63, %v2783_v57  ;;  %v2976_v2 = vmul.f32 %v4597_v44, %v2956_v3  ;;  %v2768_v60 = vmul.f32 %v4548_v48, %v4894_v39 }
 0x18e   : > { %v2612_v61 = vmul.f32 %v4496_v43, %v4873_v33  ;;  %v2991_v38 = vadd.f32 %v2975_v47, %v2939_v46  ;;  %v2732_v49 = vadd.f32 %v2716_v34, %v2679_v36  ;;  %v2820_v59 = vmul.f32 %v4560_v32, %v4896_v51  ;;  %v2906_v34 = vld [vmem:[#allocation2 + $0xc9] sm:$0xff] }
 0x18f   : > { %v3045_v6 = vmin.f32 %v3029_v54, 6.0  ;;  %v2888_v52 = vadd.f32 %v2872_v13, %v2835_v7  ;;  %v2873_v45 = vmul.f32 %v4571_v9, %v2853_v55  ;;  %v2664_v1 = vmul.f32 %v4520_v62, %v4879_v22  ;;  %v2855_v7 = vld [vmem:[#allocation2 + $0xd8] sm:$0xff] }
 0x190   : > { %v2628_v17 = vadd.f32 %v2612_v61, %v2560_v31  ;;  %v3014_v25 = vadd.f32 %v4669_v12, %v2991_v38  ;;  %v2784_v26 = vadd.f32 %v2768_v60, %v2732_v49  ;;  %v2925_v33 = vmul.f32 %v4582_v37, %v2905_v15 }
 0x191   : > { %3633 = vmatmul.mubr.msk.f32.gmra.mrb[22].mxu1 %vm2486_vm6, %v3045_v6  ;;  %v2717_v24 = vmul.f32 %v4530_v35, %v2852_v18  ;;  %v2940_v0 = vadd.f32 %v2924_v21, %v2888_v52  ;;  %v2561_v30 = vmul.f32 %v4491_v42, %v4888_v58  ;;  %v2613_v28 = vmul.f32 %v4496_v43, %v4894_v39 }
 0x192   : > { %v2680_v29 = vadd.f32 %v2664_v1, %v2628_v17  ;;  %v3030_v16 = vmax.f32 %v3014_v25, 0.0  ;;  %v2836_v50 = vadd.f32 %v2820_v59, %v2784_v26  ;;  %v2977_v22 = vmul.f32 %v4597_v44, %v2957_v4  ;;  %v2856_v59 = vld [vmem:[#allocation2 + $0xe0] sm:$0xff] }
 0x193   : > { %v2769_v47 = vmul.f32 %v4548_v48, %v2904_v19  ;;  %v2992_v5 = vadd.f32 %v2976_v2, %v2940_v0  ;;  %v2629_v27 = vadd.f32 %v2613_v28, %v2561_v30  ;;  %v2665_v14 = vmul.f32 %v4520_v62, %v4896_v51 }
 0x194   : > { %v2733_v56 = vadd.f32 %v2717_v24, %v2680_v29  ;;  %v3046_v8 = vmin.f32 %v3030_v16, 6.0  ;;  %v2889_v10 = vadd.f32 %v2873_v45, %v2836_v50  ;;  %v2821_v58 = vmul.f32 %v4560_v32, %v2956_v3  ;;  %v2959_v45 = vld [vmem:[#allocation2 + $0xda] sm:$0xff]  ;;  %v2960_v16 = vld [vmem:[#allocation2 + $0xe2] sm:$0xff] }
 0x195   : > { %v2874_v23 = vmul.f32 %v4571_v9, %v2854_v40  ;;  %v3015_v39 = vadd.f32 %v4669_v12, %v2992_v5  ;;  %v2681_v20 = vadd.f32 %v2665_v14, %v2629_v27  ;;  %v2718_v53 = vmul.f32 %v4530_v35, %v2853_v55 }
 0x196   : > { %v2785_v63 = vadd.f32 %v2769_v47, %v2733_v56  ;;  %3635 = vmatprep.mubr.msk.f32.mxu1 %vm2486_vm6, %v3046_v8  ;;  %v2941_v11 = vadd.f32 %v2925_v33, %v2889_v10  ;;  %v2770_v41 = vmul.f32 %v4548_v48, %v2905_v15  ;;  %v2562_v57 = vmul.f32 %v4491_v42, %v2852_v18  ;;  %v2958_v15 = vld [vmem:[#allocation2 + $0xca] sm:$0xff]  ;;  %v2907_v18 = vld [vmem:[#allocation2 + $0xd9] sm:$0xff]  ;;  %v2908_v33 = vld [vmem:[#allocation2 + $0xe1] sm:$0xff] }
 0x197   : > { %v2614_v51 = vmul.f32 %v4496_v43, %v2904_v19  ;;  %v3031_v13 = vmax.f32 %v3015_v39, 0.0  ;;  %v2734_v54 = vadd.f32 %v2718_v53, %v2681_v20  ;;  %v2666_v46 = vmul.f32 %v4520_v62, %v2956_v3  ;;  %v3480_v39 = vld [vmem:[%s3854_s15 + $0x21] sm:$0xff]  ;;  %v3479_v53 = vld [vmem:[%s3854_s15 + $0x19] sm:$0xff] }
 0x198   : > { %v2837_v21 = vadd.f32 %v2821_v58, %v2785_v63  ;;  %v2993_v36 = vadd.f32 %v2977_v22, %v2941_v11  ;;  %v2926_v31 = vmul.f32 %v4582_v37, %v2906_v34  ;;  %v2719_v2 = vmul.f32 %v4530_v35, %v2854_v40 }
 0x199   : > { %v2630_v55 = vadd.f32 %v2614_v51, %v2562_v57  ;;  %v3047_v60 = vmin.f32 %v3031_v13, 6.0  ;;  %v2786_v6 = vadd.f32 %v2770_v41, %v2734_v54  ;;  %v2822_v42 = vmul.f32 %v4560_v32, %v2957_v4  ;;  %v3482_v13 = vld [vmem:[%s3854_s15 + $0x39] sm:$0xff]  ;;  %v3481_v54 = vld [vmem:[%s3854_s15 + $0x31] sm:$0xff] }
 0x19a   : > { %v2890_v61 = vadd.f32 %v2874_v23, %v2837_v21  ;;  %v3016_v43 = vadd.f32 %v4669_v12, %v2993_v36  ;;  %v2771_v38 = vmul.f32 %v4548_v48, %v2906_v34  ;;  %v2978_v3 = vmul.f32 %v4597_v44, %v2958_v15 }
 0x19b   : > { %v2682_v19 = vadd.f32 %v2666_v46, %v2630_v55  ;;  %3636 = vmatmul.mubr.msk.f32.gmra.mrb[24].mxu1 %vm2486_vm6, %v3047_v60  ;;  %v2838_v49 = vadd.f32 %v2822_v42, %v2786_v6  ;;  %v2875_v35 = vmul.f32 %v4571_v9, %v2855_v7  ;;  %v2823_v4 = vmul.f32 %v4560_v32, %v2958_v15  ;;  %v3484_v55 = vld [vmem:[%s3854_s15 + $0x51] sm:$0xff] }
 0x19c   : > { %v2942_v62 = vadd.f32 %v2926_v31, %v2890_v61  ;;  %v3032_v52 = vmax.f32 %v3016_v43, 0.0  ;;  %v2927_v26 = vmul.f32 %v4582_v37, %v2907_v18  ;;  %v2876_v0 = vmul.f32 %v4571_v9, %v2856_v59  ;;  %v3483_v61 = vld [vmem:[%s3854_s15 + $0x49] sm:$0xff] }
 0x19d   : > { %v2735_v17 = vadd.f32 %v2719_v2, %v2682_v19  ;;  %v2891_v25 = vadd.f32 %v2875_v35, %v2838_v49  ;;  %v2979_v28 = vmul.f32 %v4597_v44, %v2959_v45  ;;  %v2928_v32 = vmul.f32 %v4582_v37, %v2908_v33  ;;  %v3486_v18 = vld [vmem:[%s3854_s15 + $0x69] sm:$0xff] }
 0x19e   : > { %v2994_v1 = vadd.f32 %v2978_v3, %v2942_v62  ;;  %v3048_v48 = vmin.f32 %v3032_v52, 6.0  ;;  %v2980_v56 = vmul.f32 %v4597_v44, %v2960_v16  ;;  %v4985_v44 = vld [vmem:[%s5077_s6] ss:$0 sm:$0xff]  ;;  %v3485_v62 = vld [vmem:[%s3854_s15 + $0x61] sm:$0xff] }
 0x19f   : > { %v2787_v24 = vadd.f32 %v2771_v38, %v2735_v17  ;;  %v2943_v30 = vadd.f32 %v2927_v26, %v2891_v25  ;;  %v3488_v52 = vld [vmem:[%s3854_s15 + $0x81] sm:$0xff] }
 0x1a0   : > { %v3017_v29 = vadd.f32 %v4669_v12, %v2994_v1  ;;  %3638 = vmatprep.mubr.msk.f32.mxu1 %vm2486_vm6, %v3048_v48  ;;  %v3490_v48 = vld [vmem:[%s3854_s15 + $0x99] sm:$0xff] }
 0x1a1   : > { %v2839_v50 = vadd.f32 %v2823_v4, %v2787_v24  ;;  %v2995_v47 = vadd.f32 %v2979_v28, %v2943_v30  ;;  %v3487_v4 = vld [vmem:[%s3854_s15 + $0x79] sm:$0xff] }
 0x1a2   : > { %v3033_v22 = vmax.f32 %v3017_v29, 0.0  ;;  %v3489_v29 = vld [vmem:[%s3854_s15 + $0x91] sm:$0xff] }
 0x1a3   : > { %v2892_v5 = vadd.f32 %v2876_v0, %v2839_v50  ;;  %v3018_v40 = vadd.f32 %v4669_v12, %v2995_v47 }
 0x1a4   : > { %v3049_v9 = vmin.f32 %v3033_v22, 6.0 }
 0x1a5   : > { %v2944_v27 = vadd.f32 %v2928_v32, %v2892_v5  ;;  %v3034_v14 = vmax.f32 %v3018_v40, 0.0  ;;  %v3492_v32 = vld [vmem:[%s3854_s15 + $0xb1] sm:$0xff]  ;;  %v3491_v5 = vld [vmem:[%s3854_s15 + $0xa9] sm:$0xff] }
 0x1a6   : > { %3639 = vmatmul.mubr.msk.f32.gmra.mrb[26].mxu1 %vm2486_vm6, %v3049_v9 }
 0x1a7   : > { %v2996_v8 = vadd.f32 %v2980_v56, %v2944_v27  ;;  %v3050_v10 = vmin.f32 %v3034_v14, 6.0  ;;  %v3494_v14 = vld [vmem:[%s3854_s15 + $0xc9] sm:$0xff] }
 0x1a9   : > { %v3019_v37 = vadd.f32 %v4669_v12, %v2996_v8  ;;  %3641 = vmatprep.mubr.msk.f32.mxu1 %vm2486_vm6, %v3050_v10 }
 0x1ab   : > { %v3035_v58 = vmax.f32 %v3019_v37, 0.0  ;;  %v3493_v37 = vld [vmem:[%s3854_s15 + $0xc1] sm:$0xff] }
 0x1ad   : > { %v3051_v23 = vmin.f32 %v3035_v58, 6.0 }
 0x1af   : > { %3642 = vmatmul.mubr.msk.f32.gmra.mrb[28].mxu1 %vm2486_vm6, %v3051_v23 }
 0x23c   : > { %v3622_v12 = vpop.f32.mrb[14].mxu1 }
 0x23d   : > { %v3183_v63 = vadd.f32 %v3622_v12, %v4985_v44  ;;  %v3177_v20 = vpop.f32.mrb[15].mxu1 }
 0x23e   : > { %v3178_v11 = vadd.f32 %v4985_v44, %v3177_v20 }
 0x23f   : > { %v3276_v41 = vadd.f32 %v3480_v39, %v3183_v63 }
 0x240   : > { %v3275_v57 = vadd.f32 %v3479_v53, %v3178_v11 }
 0x241   : > { %3292 = vst.msk [vmem:[%s4993_s10 + $0x8] sm:$0xff] %vm1167_vm1, %v3276_v41 }
 0x242   : > { %3291 = vst.msk [vmem:[%s4993_s10] sm:$0xff] %vm1167_vm1, %v3275_v57 }
 0x245   : > { %v3625_v51 = vpop.f32.mrb[16].mxu1 }
 0x246   : > { %v3193_v21 = vadd.f32 %v3625_v51, %v4985_v44  ;;  %v3187_v34 = vpop.f32.mrb[17].mxu1 }
 0x247   : > { %v3188_v46 = vadd.f32 %v4985_v44, %v3187_v34 }
 0x248   : > { %v3278_v36 = vadd.f32 %v3482_v13, %v3193_v21 }
 0x249   : > { %v3277_v31 = vadd.f32 %v3481_v54, %v3188_v46 }
 0x24a   : > { %3294 = vst.msk [vmem:[%s4993_s10 + $0x18] sm:$0xff] %vm1167_vm1, %v3278_v36 }
 0x24b   : > { %3293 = vst.msk [vmem:[%s4993_s10 + $0x10] sm:$0xff] %vm1167_vm1, %v3277_v31 }
 0x250   : > { %v3628_v7 = vpop.f32.mrb[18].mxu1 }
 0x251   : > { %v3203_v2 = vadd.f32 %v3628_v7, %v4985_v44  ;;  %v3197_v60 = vpop.f32.mrb[19].mxu1 }
 0x252   : > { %v3198_v15 = vadd.f32 %v4985_v44, %v3197_v60 }
 0x253   : > { %v3280_v6 = vadd.f32 %v3484_v55, %v3203_v2 }
 0x254   : > { %v3279_v42 = vadd.f32 %v3483_v61, %v3198_v15 }
 0x255   : > { %3296 = vst.msk [vmem:[%s4993_s10 + $0x28] sm:$0xff] %vm1167_vm1, %v3280_v6 }
 0x256   : > { %3295 = vst.msk [vmem:[%s4993_s10 + $0x20] sm:$0xff] %vm1167_vm1, %v3279_v42 }
 0x25b   : > { %v3631_v43 = vpop.f32.mrb[20].mxu1 }
 0x25c   : > { %v3213_v19 = vadd.f32 %v3631_v43, %v4985_v44  ;;  %v3207_v38 = vpop.f32.mrb[21].mxu1 }
 0x25d   : > { %v3208_v3 = vadd.f32 %v4985_v44, %v3207_v38 }
 0x25e   : > { %v3282_v49 = vadd.f32 %v3486_v18, %v3213_v19 }
 0x25f   : > { %v3281_v35 = vadd.f32 %v3485_v62, %v3208_v3 }
 0x260   : > { %3298 = vst.msk [vmem:[%s4993_s10 + $0x38] sm:$0xff] %vm1167_vm1, %v3282_v49 }
 0x261   : > { %3297 = vst.msk [vmem:[%s4993_s10 + $0x30] sm:$0xff] %vm1167_vm1, %v3281_v35 }
 0x264   : > { %v3634_v59 = vpop.f32.mrb[22].mxu1 }
 0x265   : > { %v3223_v45 = vadd.f32 %v3634_v59, %v4985_v44  ;;  %v3217_v17 = vpop.f32.mrb[23].mxu1 }
 0x266   : > { %v3218_v1 = vadd.f32 %v4985_v44, %v3217_v17 }
 0x267   : > { %v3284_v25 = vadd.f32 %v3488_v52, %v3223_v45 }
 0x268   : > { %v3283_v26 = vadd.f32 %v3487_v4, %v3218_v1 }
 0x269   : > { %3300 = vst.msk [vmem:[%s4993_s10 + $0x48] sm:$0xff] %vm1167_vm1, %v3284_v25 }
 0x26a   : > { %3299 = vst.msk [vmem:[%s4993_s10 + $0x40] sm:$0xff] %vm1167_vm1, %v3283_v26 }
 0x26e   : > { %v3637_v33 = vpop.f32.mrb[24].mxu1 }
 0x26f   : > { %v3233_v24 = vadd.f32 %v3637_v33, %v4985_v44  ;;  %v3227_v0 = vpop.f32.mrb[25].mxu1 }
 0x270   : > { %v3228_v30 = vadd.f32 %v4985_v44, %v3227_v0 }
 0x271   : > { %v3286_v28 = vadd.f32 %v3490_v48, %v3233_v24 }
 0x272   : > { %v3285_v16 = vadd.f32 %v3489_v29, %v3228_v30 }
 0x273   : > { %3302 = vst.msk [vmem:[%s4993_s10 + $0x58] sm:$0xff] %vm1167_vm1, %v3286_v28 }
 0x274   : > { %3301 = vst.msk [vmem:[%s4993_s10 + $0x50] sm:$0xff] %vm1167_vm1, %v3285_v16 }
 0x279   : > { %v3640_v50 = vpop.f32.mrb[26].mxu1 }
 0x27a   : > { %v3243_v22 = vadd.f32 %v3640_v50, %v4985_v44  ;;  %v3237_v47 = vpop.f32.mrb[27].mxu1 }
 0x27b   : > { %v3238_v56 = vadd.f32 %v4985_v44, %v3237_v47 }
 0x27c   : > { %v3288_v9 = vadd.f32 %v3492_v32, %v3243_v22 }
 0x27d   : > { %v3287_v40 = vadd.f32 %v3491_v5, %v3238_v56 }
 0x27e   : > { %3304 = vst.msk [vmem:[%s4993_s10 + $0x68] sm:$0xff] %vm1167_vm1, %v3288_v9 }
 0x27f   : > { %3303 = vst.msk [vmem:[%s4993_s10 + $0x60] sm:$0xff] %vm1167_vm1, %v3287_v40 }
 0x282   : > { %v3643_v27 = vpop.f32.mrb[28].mxu1 }
 0x283   : > { %v3253_v8 = vadd.f32 %v3643_v27, %v4985_v44  ;;  %v3247_v10 = vpop.f32.mrb[29].mxu1 }
 0x284   : > { %v3248_v58 = vadd.f32 %v4985_v44, %v3247_v10 }
 0x285   : > { %v3290_v23 = vadd.f32 %v3494_v14, %v3253_v8 }
 0x286   : > { %v3289_v12 = vadd.f32 %v3493_v37, %v3248_v58 }
 0x287   : > { %3306 = vst.msk [vmem:[%s4993_s10 + $0x78] sm:$0xff] %vm1167_vm1, %v3290_v23 }
 0x288   : > { %3305 = vst.msk [vmem:[%s4993_s10 + $0x70] sm:$0xff] %vm1167_vm1, %v3289_v12 }
 0x289 PF: > { %s17_s28 = sadd.s32 1, %s3756_s28   ;;  %s5131_s24 = smov %s3748_s26 }
 0x28a   : > { %p14_p7 = scmp.ge.s32.totalorder %s17_s28, 6   ;;  %s5132_s25 = smov %s3752_s27 }
 0x28b   : > { %s5133_s26 = smov %s5136_s29  ;;  %s5134_s27 = smov %s5140_s30 }
 0x28c   :  { %16 = sbr.rel (!%p14_p7) target bundleno = 3 (0x3), region = 82 }

</bundles_post_ra>
